<compile_context>
chip_gen: v7x
topology: tpu7x:2x2x1
jax: 0.10.0
libtpu: 0.0.40
codegen_flags: <defaults>
</compile_context>

<pallas_src>
import functools

import numpy as np
import jax
import jax.numpy as jnp
from jax.experimental import pallas as pl
from jax.experimental.pallas import tpu as pltpu


def _round_up(x, m):
    return ((x + m - 1) // m) * m


# ------------------------------ fused kernel --------------------------------

def _fused_kernel(kh_list, oh_last, *refs):
    """Whole forward pass on VMEM-resident data.

    Activations are 2-D: rows = (b, y), cols = (x, c).  Each conv is
        out = relu( sum_i  R_i @ act @ Wband_i  + bias_band )
    (implicit GEMM via banded weights -- no patch matrix anywhere).  The head
    re-orders the last conv output into torch's NCHW flatten order with the
    same selection-matmul trick (one small pair of matmuls per output row).
    """
    n_convs = len(kh_list)
    n_in = 1 + 3 * n_convs + 5
    in_refs, out_refs = refs[:n_in], refs[n_in:]
    h_ref, v_ref = out_refs

    x_ref = in_refs[0]
    cd = x_ref.dtype                      # MXU operand dtype (f32 or bf16)
    a = x_ref[...]                        # (B*H, W*C)

    p = 1
    for l in range(n_convs):
        r_ref, wb_ref, bb_ref = in_refs[p], in_refs[p + 1], in_refs[p + 2]
        p += 3
        acc = None
        for i in range(kh_list[l]):       # static unroll over kernel rows
            rows = jnp.dot(r_ref[i], a,
                           preferred_element_type=jnp.float32).astype(cd)
            t = jnp.dot(rows, wb_ref[i], preferred_element_type=jnp.float32)
            acc = t if acc is None else acc + t
        a = jnp.maximum(acc + bb_ref[...], 0.0).astype(cd)   # (B*OH, OW*OC)

    s_ref, wcat_ref, bcat_ref, wv_ref, bv_ref = in_refs[p:p + 5]
    hacc = None
    for oy in range(oh_last):             # static unroll over output rows
        rows = jnp.dot(s_ref[oy], a,
                       preferred_element_type=jnp.float32).astype(cd)
        t = jnp.dot(rows, wcat_ref[oy], preferred_element_type=jnp.float32)
        hacc = t if hacc is None else hacc + t
    h = jnp.maximum(hacc + bcat_ref[...], 0.0)                # (B, Npad) f32
    h_ref[...] = h.astype(h_ref.dtype)                        # lane-dense store

    # N=1 value projection: VPU multiply + lane reduction (lanes >= h_v carry
    # zero weights, so no slicing is needed).
    v = jnp.sum(h * wv_ref[...], axis=-1, keepdims=True) + bv_ref[...]
    v_ref[...] = v.astype(v_ref.dtype)


def _full_spec(arr):
    nd = arr.ndim
    return pl.BlockSpec(arr.shape, lambda i, _nd=nd: (0,) * _nd)


def _fused_pallas_call(cfg, inputs):
    B, n_pad = cfg["batch"], cfg["n_pad"]
    in_bytes = sum(int(np.prod(a.shape)) * a.dtype.itemsize for a in inputs)
    cost = pl.CostEstimate(flops=cfg["cost_flops"], transcendentals=0,
                           bytes_accessed=int(in_bytes + B * (n_pad + 1) * 4))
    kernel = functools.partial(_fused_kernel, cfg["kh_list"], cfg["oh_last"])
    return pl.pallas_call(
        kernel,
        out_shape=(jax.ShapeDtypeStruct((B, n_pad), jnp.float32),
                   jax.ShapeDtypeStruct((B, 1), jnp.float32)),
        # Whole problem fits in well under 1 MiB of VMEM, so one grid step
        # (one launch, zero intermediate HBM traffic) is the right choice.
        grid=(1,),
        in_specs=[_full_spec(a) for a in inputs],
        out_specs=(pl.BlockSpec((B, n_pad), lambda i: (0, 0)),
                   pl.BlockSpec((B, 1), lambda i: (0, 0))),
        compiler_params=pltpu.CompilerParams(
            dimension_semantics=("arbitrary",),
            vmem_limit_bytes=32 * 1024 * 1024),
        cost_estimate=cost,
    )(*inputs)


# ---------------- generic linear kernel (multi-layer-head fallback) ---------

def _linear_kernel(x_ref, w_ref, b_ref, o_ref, *, relu):
    y = jnp.dot(x_ref[...].astype(w_ref.dtype), w_ref[...],
                preferred_element_type=jnp.float32) + b_ref[...]
    if relu:
        y = jnp.maximum(y, 0.0)
    o_ref[...] = y.astype(o_ref.dtype)


def pallas_linear(x, w, b, *, relu=False):
    """y = x @ w + b, optional fused ReLU.  Single-block kernel used only for
    the (unexercised here) multi-hidden-layer head configuration."""
    M, K = x.shape
    N = w.shape[1]
    return pl.pallas_call(
        functools.partial(_linear_kernel, relu=relu),
        out_shape=jax.ShapeDtypeStruct((M, N), jnp.float32),
        grid=(1,),
        in_specs=[pl.BlockSpec((M, K), lambda i: (0, 0)),
                  pl.BlockSpec((K, N), lambda i: (0, 0)),
                  pl.BlockSpec((1, N), lambda i: (0, 0))],
        out_specs=pl.BlockSpec((M, N), lambda i: (0, 0)),
        compiler_params=pltpu.CompilerParams(
            dimension_semantics=("arbitrary",)),
    )(x, w, b.reshape(1, N).astype(jnp.float32))


# --------------------------- parameter preparation --------------------------

def prepare_params(params, input_hw, batch, compute_dtype=jnp.float32):
    """One-time host-side conversion of PyTorch-layout params into the fused
    kernel's banded-weight / selection-matrix layout.

    NOTE: the row-selection constants (R, S) depend on the batch size, so the
    prepared params are specific to `batch`.
    """
    H, W = int(input_hw[0]), int(input_hw[1])
    B = int(batch)
    cd = compute_dtype

    r_list, wb_list, bb_list, kh_list = [], [], [], []
    flops = 0
    C = int(params["convs"][0][0].shape[1])
    for (w, b, s) in params["convs"]:
        w_np = np.asarray(w, np.float32)              # (OC, Cin, KH, KW)
        b_np = np.asarray(b, np.float32)
        OC, Cin, KH, KW = w_np.shape
        OH = (H - KH) // s + 1
        OW = (W - KW) // s + 1

        # Row-shift/stride selection: picks input row (b, s*oy + i).
        r = np.zeros((KH, B * OH, B * H), np.float32)
        for i in range(KH):
            for bb in range(B):
                for oy in range(OH):
                    r[i, bb * OH + oy, bb * H + s * oy + i] = 1.0

        # Banded weight: Wband[i][(s*ox+j)*Cin + c, ox*OC + oc] = W[oc,c,i,j].
        wband = np.zeros((KH, W * Cin, OW * OC), np.float32)
        for i in range(KH):
            for j in range(KW):
                for ox in range(OW):
                    w_in = s * ox + j
                    wband[i, w_in * Cin:(w_in + 1) * Cin,
                          ox * OC:(ox + 1) * OC] = w_np[:, :, i, j].T

        bband = np.tile(b_np, OW).reshape(1, OW * OC)

        r_list.append(jnp.asarray(r, cd))
        wb_list.append(jnp.asarray(wband, cd))
        bb_list.append(jnp.asarray(bband, jnp.float32))
        kh_list.append(KH)
        flops += KH * 2 * (B * OH) * (B * H) * (W * Cin)
        flops += KH * 2 * (B * OH) * (W * Cin) * (OW * OC)
        H, W, C = OH, OW, OC

    # ---- head: first fc layer of value branch + every action branch, fused,
    #      padded to a lane-dense 128-multiple output ----
    value_layers = params["value"]
    branches = params["action_branches"]
    h_v = int(value_layers[0][0].shape[1])
    h_a = tuple(int(br[0][0].shape[1]) for br in branches)
    w_first = [np.asarray(value_layers[0][0], np.float32)]
    b_first = [np.asarray(value_layers[0][1], np.float32)]
    for br in branches:
        w_first.append(np.asarray(br[0][0], np.float32))
        b_first.append(np.asarray(br[0][1], np.float32))
    w_src = np.concatenate(w_first, axis=1)      # rows in torch NCHW-flatten order
    b_src = np.concatenate(b_first, axis=0)
    n_cat = w_src.shape[1]
    n_pad = _round_up(n_cat, 128)
    assert w_src.shape[0] == C * H * W, (w_src.shape, C, H, W)

    s_sel = np.zeros((H, B, B * H), np.float32)  # H == OH of the last conv
    for oy in range(H):
        for bb in range(B):
            s_sel[oy, bb, bb * H + oy] = 1.0

    w_cat = np.zeros((H, W * C, n_pad), np.float32)
    for oy in range(H):
        for ox in range(W):
            feats = np.arange(C) * (H * W) + oy * W + ox
            w_cat[oy, ox * C:(ox + 1) * C, :n_cat] = w_src[feats, :]
    b_cat = np.zeros((1, n_pad), np.float32)
    b_cat[0, :n_cat] = b_src
    flops += H * 2 * B * (B * H) * (W * C)
    flops += H * 2 * B * (W * C) * n_pad

    fused_value = (len(value_layers) == 1 and all(len(br) == 1 for br in branches))
    wv_row = np.zeros((1, n_pad), np.float32)
    bv = np.zeros((1, 1), np.float32)
    if fused_value:
        wv_row[0, :h_v] = np.asarray(params["value_out"][0], np.float32)[:, 0]
        bv[0, 0] = float(np.asarray(params["value_out"][1], np.float32)[0])

    prep = {
        "conv_R": r_list, "conv_Wband": wb_list, "conv_bband": bb_list,
        "S": jnp.asarray(s_sel, cd), "Wcat": jnp.asarray(w_cat, cd),
        "bcat": jnp.asarray(b_cat, jnp.float32),
        "wv": jnp.asarray(wv_row, jnp.float32),
        "bv": jnp.asarray(bv, jnp.float32),
        # Fallback weights for multi-hidden-layer heads (unused for the demo).
        "rest_actions": [[(jnp.asarray(w, cd), jnp.asarray(b, jnp.float32))
                          for (w, b) in br[1:]] for br in branches],
        "rest_value": [(jnp.asarray(w, cd), jnp.asarray(b, jnp.float32))
                       for (w, b) in value_layers[1:]],
        "w_vout": jnp.asarray(params["value_out"][0], cd),
        "b_vout": jnp.asarray(params["value_out"][1], jnp.float32),
    }
    cfg = {
        "batch": B,
        "kh_list": tuple(kh_list),
        "oh_last": H,
        "h_v": h_v,
        "h_a": h_a,
        "n_pad": n_pad,
        "fused_value": fused_value,
        "compute_dtype": cd,
        "cost_flops": int(flops),
    }
    return prep, cfg


# ------------------------------- forward pass -------------------------------

def branch_cnn_forward(cfg, prep, x_nchw):
    """Pallas forward. Returns (value [B,1], [actor_feature_i])."""
    B, C, H, W = x_nchw.shape
    cd = cfg["compute_dtype"]
    # Single NCHW -> (b*h, w*c) transpose+flatten; in the bf16 path the cast
    # happens here so the kernel is fed bf16 activations directly.
    x2d = jnp.transpose(x_nchw, (0, 2, 3, 1)).reshape(B * H, W * C).astype(cd)

    inputs = [x2d]
    for r, wb, bb in zip(prep["conv_R"], prep["conv_Wband"], prep["conv_bband"]):
        inputs += [r, wb, bb]
    inputs += [prep["S"], prep["Wcat"], prep["bcat"], prep["wv"], prep["bv"]]

    h_pad, val = _fused_pallas_call(cfg, inputs)

    off = cfg["h_v"]
    actor_features = []
    for ha in cfg["h_a"]:
        actor_features.append(h_pad[:, off:off + ha])
        off += ha

    if not cfg["fused_value"]:
        # Deeper heads: finish remaining fc layers with the generic kernel.
        for i, layers in enumerate(prep["rest_actions"]):
            for (w, b) in layers:
                actor_features[i] = pallas_linear(actor_features[i], w, b, relu=True)
        v = h_pad[:, :cfg["h_v"]]
        for (w, b) in prep["rest_value"]:
            v = pallas_linear(v, w, b, relu=True)
        val = pallas_linear(v, prep["w_vout"], prep["b_vout"], relu=False)
    return val, actor_features


# --------------------------- parameter construction -------------------------

def init_params(key, *, in_channels, convs, in_feature,
                hidden_actions, hidden_value, num_branches):
    """Parameters in PyTorch layout: conv [OC, C, KH, KW]; fc stored [in, out]."""
    state = [key]

    def nk():
        state[0], sub = jax.random.split(state[0])
        return sub

    def uinit(shape, fan_in):
        bound = float(fan_in) ** -0.5
        return jax.random.uniform(nk(), shape, jnp.float32, -bound, bound)

    p = {"convs": [], "action_branches": [], "value": []}
    c_in = in_channels
    for (oc, k, s) in convs:
        p["convs"].append((uinit((oc, c_in, k, k), c_in * k * k),
                           uinit((oc,), c_in * k * k), s))
        c_in = oc
    for _ in range(num_branches):
        layers, f_in = [], in_feature
        for hdim in hidden_actions:
            layers.append((uinit((f_in, hdim), f_in), uinit((hdim,), f_in)))
            f_in = hdim
        p["action_branches"].append(layers)
    f_in = in_feature
    for hdim in hidden_value:
        p["value"].append((uinit((f_in, hdim), f_in), uinit((hdim,), f_in)))
        f_in = hdim
    p["value_out"] = (uinit((f_in, 1), f_in), uinit((1,), f_in))
    return p


# ------------------------------ pure-JAX reference --------------------------

def reference_forward(params, x_nchw):
    """Pure-JAX NCHW reference matching the PyTorch module exactly."""
    hp = jax.lax.Precision.HIGHEST
    x = x_nchw
    for (w, b, s) in params["convs"]:
        y = jax.lax.conv_general_dilated(
            x, w, window_strides=(s, s), padding="VALID",
            dimension_numbers=("NCHW", "OIHW", "NCHW"), precision=hp)
        x = jax.nn.relu(y + b[None, :, None, None])
    B = x.shape[0]
    x = x.reshape(B, -1)                              # torch x.view(B, -1)
    actor_features = []
    for layers in params["action_branches"]:
        h = x
        for (w, b) in layers:
            h = jax.nn.relu(jnp.dot(h, w, precision=hp) + b)
        actor_features.append(h)
    v = x
    for (w, b) in params["value"]:
        v = jax.nn.relu(jnp.dot(v, w, precision=hp) + b)
    w, b = params["value_out"]
    return jnp.dot(v, w, precision=hp) + b, actor_features


# ----------------------------------- main -----------------------------------

if __name__ == "__main__":
    IN_CHANNELS = 4
    SPATIAL = 16
    BATCH = 2
    CONVS = [(16, 4, 2), (32, 3, 1)]          # (out_channels, kernel, stride)
    HIDDEN_ACTIONS = [32]
    HIDDEN_VALUE = [32]
    ACTION_SPACES = [3, 3]                    # -> 2 action branches

    hw = SPATIAL
    for (_, k, s) in CONVS:
        hw = (hw - k) // s + 1
    in_feature = hw * hw * CONVS[-1][0]       # 5*5*32 = 800

    key = jax.random.PRNGKey(0)
    k_x, k_p = jax.random.split(key)
    x = jax.random.normal(k_x, (BATCH, IN_CHANNELS, SPATIAL, SPATIAL), jnp.float32)
    params = init_params(k_p, in_channels=IN_CHANNELS, convs=CONVS,
                         in_feature=in_feature, hidden_actions=HIDDEN_ACTIONS,
                         hidden_value=HIDDEN_VALUE,
                         num_branches=len(ACTION_SPACES))

    ref_val, ref_actors = reference_forward(params, x)

    # ---- f32 Pallas path ----
    prep32, cfg32 = prepare_params(params, (SPATIAL, SPATIAL), BATCH, jnp.float32)
    fwd32 = jax.jit(functools.partial(branch_cnn_forward, cfg32))
    val, actors = jax.block_until_ready(fwd32(prep32, x))
    assert val.shape == (BATCH, 1), val.shape
    assert len(actors) == len(ACTION_SPACES)
    assert all(a.shape == (BATCH, HIDDEN_ACTIONS[-1]) for a in actors)
    assert jnp.allclose(val, ref_val, atol=2e-3, rtol=2e-3), \
        float(jnp.max(jnp.abs(val - ref_val)))
    for a, ra in zip(actors, ref_actors):
        assert jnp.allclose(a, ra, atol=2e-3, rtol=2e-3), \
            float(jnp.max(jnp.abs(a - ra)))

    # ---- bf16 MXU-operand path (f32 accumulate / bias / ReLU / value) ----
    prep16, cfg16 = prepare_params(params, (SPATIAL, SPATIAL), BATCH, jnp.bfloat16)
    fwd16 = jax.jit(functools.partial(branch_cnn_forward, cfg16))
    val16, actors16 = jax.block_until_ready(fwd16(prep16, x))
    assert jnp.allclose(val16, ref_val, atol=5e-2, rtol=5e-2)
    for a, ra in zip(actors16, ref_actors):
        assert jnp.allclose(a, ra, atol=5e-2, rtol=5e-2)

    print("KERNEL_OK")
</pallas_src>

<mosaic_0001>
module attributes {stable_mosaic.version = 11 : i64} {
  func.func @_fused_kernel(%arg0: i32, %arg1: memref<32x64xf32, #tpu.memory_space<vmem>>, %arg2: memref<4x14x32xf32, #tpu.memory_space<vmem>>, %arg3: memref<4x64x112xf32, #tpu.memory_space<vmem>>, %arg4: memref<1x112xf32, #tpu.memory_space<vmem>>, %arg5: memref<3x10x14xf32, #tpu.memory_space<vmem>>, %arg6: memref<3x112x160xf32, #tpu.memory_space<vmem>>, %arg7: memref<1x160xf32, #tpu.memory_space<vmem>>, %arg8: memref<5x2x10xf32, #tpu.memory_space<vmem>>, %arg9: memref<5x160x128xf32, #tpu.memory_space<vmem>>, %arg10: memref<1x128xf32, #tpu.memory_space<vmem>>, %arg11: memref<1x128xf32, #tpu.memory_space<vmem>>, %arg12: memref<1x1xf32, #tpu.memory_space<vmem>>, %arg13: memref<2x128xf32, #tpu.memory_space<vmem>>, %arg14: memref<2x1xf32, #tpu.memory_space<vmem>>) attributes {dimension_semantics = [#tpu.dimension_semantics<arbitrary>], iteration_bounds = array<i64: 1>, scalar_prefetch = 0 : i64, scratch_operands = 0 : i64, tpu.core_type = #tpu.core_type<tc>, window_params = [{pipeline_mode = #tpu.pipeline_mode<synchronous>, transform_indices = @transform_0, window_bounds = array<i64: 32, 64>}, {pipeline_mode = #tpu.pipeline_mode<synchronous>, transform_indices = @transform_1, window_bounds = array<i64: 4, 14, 32>}, {pipeline_mode = #tpu.pipeline_mode<synchronous>, transform_indices = @transform_2, window_bounds = array<i64: 4, 64, 112>}, {pipeline_mode = #tpu.pipeline_mode<synchronous>, transform_indices = @transform_3, window_bounds = array<i64: 1, 112>}, {pipeline_mode = #tpu.pipeline_mode<synchronous>, transform_indices = @transform_4, window_bounds = array<i64: 3, 10, 14>}, {pipeline_mode = #tpu.pipeline_mode<synchronous>, transform_indices = @transform_5, window_bounds = array<i64: 3, 112, 160>}, {pipeline_mode = #tpu.pipeline_mode<synchronous>, transform_indices = @transform_6, window_bounds = array<i64: 1, 160>}, {pipeline_mode = #tpu.pipeline_mode<synchronous>, transform_indices = @transform_7, window_bounds = array<i64: 5, 2, 10>}, {pipeline_mode = #tpu.pipeline_mode<synchronous>, transform_indices = @transform_8, window_bounds = array<i64: 5, 160, 128>}, {pipeline_mode = #tpu.pipeline_mode<synchronous>, transform_indices = @transform_9, window_bounds = array<i64: 1, 128>}, {pipeline_mode = #tpu.pipeline_mode<synchronous>, transform_indices = @transform_10, window_bounds = array<i64: 1, 128>}, {pipeline_mode = #tpu.pipeline_mode<synchronous>, transform_indices = @transform_11, window_bounds = array<i64: 1, 1>}, {pipeline_mode = #tpu.pipeline_mode<synchronous>, transform_indices = @transform_12, window_bounds = array<i64: 2, 128>}, {pipeline_mode = #tpu.pipeline_mode<synchronous>, transform_indices = @transform_13, window_bounds = array<i64: 2, 1>}]} {
    %c0 = arith.constant 0 : index
    %c0_0 = arith.constant 0 : index
    %0 = vector.load %arg1[%c0, %c0_0] : memref<32x64xf32, #tpu.memory_space<vmem>>, vector<32x64xf32>
    %c0_1 = arith.constant 0 : index
    %c0_2 = arith.constant 0 : index
    %c0_3 = arith.constant 0 : index
    %1 = vector.load %arg2[%c0_1, %c0_2, %c0_3] : memref<4x14x32xf32, #tpu.memory_space<vmem>>, vector<1x14x32xf32>
    %2 = vector.shape_cast %1 : vector<1x14x32xf32> to vector<14x32xf32>
    %cst = arith.constant dense<0.000000e+00> : vector<14x64xf32>
    %3 = tpu.matmul %2, %0, %cst {dimension_numbers = #tpu.dot_dimension_numbers<[1], [0], [0], [1], [0, 0, 1, 1], [], []>} : vector<14x32xf32>, vector<32x64xf32>, vector<14x64xf32> -> vector<14x64xf32>
    %c0_4 = arith.constant 0 : index
    %c0_5 = arith.constant 0 : index
    %c0_6 = arith.constant 0 : index
    %4 = vector.load %arg3[%c0_4, %c0_5, %c0_6] : memref<4x64x112xf32, #tpu.memory_space<vmem>>, vector<1x64x112xf32>
    %5 = vector.shape_cast %4 : vector<1x64x112xf32> to vector<64x112xf32>
    %cst_7 = arith.constant dense<0.000000e+00> : vector<14x112xf32>
    %6 = tpu.matmul %3, %5, %cst_7 {dimension_numbers = #tpu.dot_dimension_numbers<[1], [0], [0], [1], [0, 0, 1, 1], [], []>} : vector<14x64xf32>, vector<64x112xf32>, vector<14x112xf32> -> vector<14x112xf32>
    %c1 = arith.constant 1 : index
    %c0_8 = arith.constant 0 : index
    %c0_9 = arith.constant 0 : index
    %7 = vector.load %arg2[%c1, %c0_8, %c0_9] : memref<4x14x32xf32, #tpu.memory_space<vmem>>, vector<1x14x32xf32>
    %8 = vector.shape_cast %7 : vector<1x14x32xf32> to vector<14x32xf32>
    %cst_10 = arith.constant dense<0.000000e+00> : vector<14x64xf32>
    %9 = tpu.matmul %8, %0, %cst_10 {dimension_numbers = #tpu.dot_dimension_numbers<[1], [0], [0], [1], [0, 0, 1, 1], [], []>} : vector<14x32xf32>, vector<32x64xf32>, vector<14x64xf32> -> vector<14x64xf32>
    %c1_11 = arith.constant 1 : index
    %c0_12 = arith.constant 0 : index
    %c0_13 = arith.constant 0 : index
    %10 = vector.load %arg3[%c1_11, %c0_12, %c0_13] : memref<4x64x112xf32, #tpu.memory_space<vmem>>, vector<1x64x112xf32>
    %11 = vector.shape_cast %10 : vector<1x64x112xf32> to vector<64x112xf32>
    %cst_14 = arith.constant dense<0.000000e+00> : vector<14x112xf32>
    %12 = tpu.matmul %9, %11, %cst_14 {dimension_numbers = #tpu.dot_dimension_numbers<[1], [0], [0], [1], [0, 0, 1, 1], [], []>} : vector<14x64xf32>, vector<64x112xf32>, vector<14x112xf32> -> vector<14x112xf32>
    %13 = arith.addf %6, %12 : vector<14x112xf32>
    %c2 = arith.constant 2 : index
    %c0_15 = arith.constant 0 : index
    %c0_16 = arith.constant 0 : index
    %14 = vector.load %arg2[%c2, %c0_15, %c0_16] : memref<4x14x32xf32, #tpu.memory_space<vmem>>, vector<1x14x32xf32>
    %15 = vector.shape_cast %14 : vector<1x14x32xf32> to vector<14x32xf32>
    %cst_17 = arith.constant dense<0.000000e+00> : vector<14x64xf32>
    %16 = tpu.matmul %15, %0, %cst_17 {dimension_numbers = #tpu.dot_dimension_numbers<[1], [0], [0], [1], [0, 0, 1, 1], [], []>} : vector<14x32xf32>, vector<32x64xf32>, vector<14x64xf32> -> vector<14x64xf32>
    %c2_18 = arith.constant 2 : index
    %c0_19 = arith.constant 0 : index
    %c0_20 = arith.constant 0 : index
    %17 = vector.load %arg3[%c2_18, %c0_19, %c0_20] : memref<4x64x112xf32, #tpu.memory_space<vmem>>, vector<1x64x112xf32>
    %18 = vector.shape_cast %17 : vector<1x64x112xf32> to vector<64x112xf32>
    %cst_21 = arith.constant dense<0.000000e+00> : vector<14x112xf32>
    %19 = tpu.matmul %16, %18, %cst_21 {dimension_numbers = #tpu.dot_dimension_numbers<[1], [0], [0], [1], [0, 0, 1, 1], [], []>} : vector<14x64xf32>, vector<64x112xf32>, vector<14x112xf32> -> vector<14x112xf32>
    %20 = arith.addf %13, %19 : vector<14x112xf32>
    %c3 = arith.constant 3 : index
    %c0_22 = arith.constant 0 : index
    %c0_23 = arith.constant 0 : index
    %21 = vector.load %arg2[%c3, %c0_22, %c0_23] : memref<4x14x32xf32, #tpu.memory_space<vmem>>, vector<1x14x32xf32>
    %22 = vector.shape_cast %21 : vector<1x14x32xf32> to vector<14x32xf32>
    %cst_24 = arith.constant dense<0.000000e+00> : vector<14x64xf32>
    %23 = tpu.matmul %22, %0, %cst_24 {dimension_numbers = #tpu.dot_dimension_numbers<[1], [0], [0], [1], [0, 0, 1, 1], [], []>} : vector<14x32xf32>, vector<32x64xf32>, vector<14x64xf32> -> vector<14x64xf32>
    %c3_25 = arith.constant 3 : index
    %c0_26 = arith.constant 0 : index
    %c0_27 = arith.constant 0 : index
    %24 = vector.load %arg3[%c3_25, %c0_26, %c0_27] : memref<4x64x112xf32, #tpu.memory_space<vmem>>, vector<1x64x112xf32>
    %25 = vector.shape_cast %24 : vector<1x64x112xf32> to vector<64x112xf32>
    %cst_28 = arith.constant dense<0.000000e+00> : vector<14x112xf32>
    %26 = tpu.matmul %23, %25, %cst_28 {dimension_numbers = #tpu.dot_dimension_numbers<[1], [0], [0], [1], [0, 0, 1, 1], [], []>} : vector<14x64xf32>, vector<64x112xf32>, vector<14x112xf32> -> vector<14x112xf32>
    %27 = arith.addf %20, %26 : vector<14x112xf32>
    %c0_29 = arith.constant 0 : index
    %c0_30 = arith.constant 0 : index
    %28 = vector.load %arg4[%c0_29, %c0_30] : memref<1x112xf32, #tpu.memory_space<vmem>>, vector<1x112xf32>
    %29 = vector.broadcast %28 : vector<1x112xf32> to vector<14x112xf32>
    %30 = arith.addf %27, %29 : vector<14x112xf32>
    %cst_31 = arith.constant 0.000000e+00 : f32
    %31 = vector.broadcast %cst_31 : f32 to vector<14x112xf32>
    %32 = arith.maximumf %30, %31 : vector<14x112xf32>
    %c0_32 = arith.constant 0 : index
    %c0_33 = arith.constant 0 : index
    %c0_34 = arith.constant 0 : index
    %33 = vector.load %arg5[%c0_32, %c0_33, %c0_34] : memref<3x10x14xf32, #tpu.memory_space<vmem>>, vector<1x10x14xf32>
    %34 = vector.shape_cast %33 : vector<1x10x14xf32> to vector<10x14xf32>
    %cst_35 = arith.constant dense<0.000000e+00> : vector<10x112xf32>
    %35 = tpu.matmul %34, %32, %cst_35 {dimension_numbers = #tpu.dot_dimension_numbers<[1], [0], [0], [1], [0, 0, 1, 1], [], []>} : vector<10x14xf32>, vector<14x112xf32>, vector<10x112xf32> -> vector<10x112xf32>
    %c0_36 = arith.constant 0 : index
    %c0_37 = arith.constant 0 : index
    %c0_38 = arith.constant 0 : index
    %36 = vector.load %arg6[%c0_36, %c0_37, %c0_38] : memref<3x112x160xf32, #tpu.memory_space<vmem>>, vector<1x112x160xf32>
    %37 = vector.shape_cast %36 : vector<1x112x160xf32> to vector<112x160xf32>
    %cst_39 = arith.constant dense<0.000000e+00> : vector<10x160xf32>
    %38 = tpu.matmul %35, %37, %cst_39 {dimension_numbers = #tpu.dot_dimension_numbers<[1], [0], [0], [1], [0, 0, 1, 1], [], []>} : vector<10x112xf32>, vector<112x160xf32>, vector<10x160xf32> -> vector<10x160xf32>
    %c1_40 = arith.constant 1 : index
    %c0_41 = arith.constant 0 : index
    %c0_42 = arith.constant 0 : index
    %39 = vector.load %arg5[%c1_40, %c0_41, %c0_42] : memref<3x10x14xf32, #tpu.memory_space<vmem>>, vector<1x10x14xf32>
    %40 = vector.shape_cast %39 : vector<1x10x14xf32> to vector<10x14xf32>
    %cst_43 = arith.constant dense<0.000000e+00> : vector<10x112xf32>
    %41 = tpu.matmul %40, %32, %cst_43 {dimension_numbers = #tpu.dot_dimension_numbers<[1], [0], [0], [1], [0, 0, 1, 1], [], []>} : vector<10x14xf32>, vector<14x112xf32>, vector<10x112xf32> -> vector<10x112xf32>
    %c1_44 = arith.constant 1 : index
    %c0_45 = arith.constant 0 : index
    %c0_46 = arith.constant 0 : index
    %42 = vector.load %arg6[%c1_44, %c0_45, %c0_46] : memref<3x112x160xf32, #tpu.memory_space<vmem>>, vector<1x112x160xf32>
    %43 = vector.shape_cast %42 : vector<1x112x160xf32> to vector<112x160xf32>
    %cst_47 = arith.constant dense<0.000000e+00> : vector<10x160xf32>
    %44 = tpu.matmul %41, %43, %cst_47 {dimension_numbers = #tpu.dot_dimension_numbers<[1], [0], [0], [1], [0, 0, 1, 1], [], []>} : vector<10x112xf32>, vector<112x160xf32>, vector<10x160xf32> -> vector<10x160xf32>
    %45 = arith.addf %38, %44 : vector<10x160xf32>
    %c2_48 = arith.constant 2 : index
    %c0_49 = arith.constant 0 : index
    %c0_50 = arith.constant 0 : index
    %46 = vector.load %arg5[%c2_48, %c0_49, %c0_50] : memref<3x10x14xf32, #tpu.memory_space<vmem>>, vector<1x10x14xf32>
    %47 = vector.shape_cast %46 : vector<1x10x14xf32> to vector<10x14xf32>
    %cst_51 = arith.constant dense<0.000000e+00> : vector<10x112xf32>
    %48 = tpu.matmul %47, %32, %cst_51 {dimension_numbers = #tpu.dot_dimension_numbers<[1], [0], [0], [1], [0, 0, 1, 1], [], []>} : vector<10x14xf32>, vector<14x112xf32>, vector<10x112xf32> -> vector<10x112xf32>
    %c2_52 = arith.constant 2 : index
    %c0_53 = arith.constant 0 : index
    %c0_54 = arith.constant 0 : index
    %49 = vector.load %arg6[%c2_52, %c0_53, %c0_54] : memref<3x112x160xf32, #tpu.memory_space<vmem>>, vector<1x112x160xf32>
    %50 = vector.shape_cast %49 : vector<1x112x160xf32> to vector<112x160xf32>
    %cst_55 = arith.constant dense<0.000000e+00> : vector<10x160xf32>
    %51 = tpu.matmul %48, %50, %cst_55 {dimension_numbers = #tpu.dot_dimension_numbers<[1], [0], [0], [1], [0, 0, 1, 1], [], []>} : vector<10x112xf32>, vector<112x160xf32>, vector<10x160xf32> -> vector<10x160xf32>
    %52 = arith.addf %45, %51 : vector<10x160xf32>
    %c0_56 = arith.constant 0 : index
    %c0_57 = arith.constant 0 : index
    %53 = vector.load %arg7[%c0_56, %c0_57] : memref<1x160xf32, #tpu.memory_space<vmem>>, vector<1x160xf32>
    %54 = vector.broadcast %53 : vector<1x160xf32> to vector<10x160xf32>
    %55 = arith.addf %52, %54 : vector<10x160xf32>
    %cst_58 = arith.constant 0.000000e+00 : f32
    %56 = vector.broadcast %cst_58 : f32 to vector<10x160xf32>
    %57 = arith.maximumf %55, %56 : vector<10x160xf32>
    %c0_59 = arith.constant 0 : index
    %c0_60 = arith.constant 0 : index
    %c0_61 = arith.constant 0 : index
    %58 = vector.load %arg8[%c0_59, %c0_60, %c0_61] : memref<5x2x10xf32, #tpu.memory_space<vmem>>, vector<1x2x10xf32>
    %59 = vector.shape_cast %58 : vector<1x2x10xf32> to vector<2x10xf32>
    %cst_62 = arith.constant dense<0.000000e+00> : vector<2x160xf32>
    %60 = tpu.matmul %59, %57, %cst_62 {dimension_numbers = #tpu.dot_dimension_numbers<[1], [0], [0], [1], [0, 0, 1, 1], [], []>} : vector<2x10xf32>, vector<10x160xf32>, vector<2x160xf32> -> vector<2x160xf32>
    %c0_63 = arith.constant 0 : index
    %c0_64 = arith.constant 0 : index
    %c0_65 = arith.constant 0 : index
    %61 = vector.load %arg9[%c0_63, %c0_64, %c0_65] : memref<5x160x128xf32, #tpu.memory_space<vmem>>, vector<1x160x128xf32>
    %62 = vector.shape_cast %61 : vector<1x160x128xf32> to vector<160x128xf32>
    %cst_66 = arith.constant dense<0.000000e+00> : vector<2x128xf32>
    %63 = tpu.matmul %60, %62, %cst_66 {dimension_numbers = #tpu.dot_dimension_numbers<[1], [0], [0], [1], [0, 0, 1, 1], [], []>} : vector<2x160xf32>, vector<160x128xf32>, vector<2x128xf32> -> vector<2x128xf32>
    %c1_67 = arith.constant 1 : index
    %c0_68 = arith.constant 0 : index
    %c0_69 = arith.constant 0 : index
    %64 = vector.load %arg8[%c1_67, %c0_68, %c0_69] : memref<5x2x10xf32, #tpu.memory_space<vmem>>, vector<1x2x10xf32>
    %65 = vector.shape_cast %64 : vector<1x2x10xf32> to vector<2x10xf32>
    %cst_70 = arith.constant dense<0.000000e+00> : vector<2x160xf32>
    %66 = tpu.matmul %65, %57, %cst_70 {dimension_numbers = #tpu.dot_dimension_numbers<[1], [0], [0], [1], [0, 0, 1, 1], [], []>} : vector<2x10xf32>, vector<10x160xf32>, vector<2x160xf32> -> vector<2x160xf32>
    %c1_71 = arith.constant 1 : index
    %c0_72 = arith.constant 0 : index
    %c0_73 = arith.constant 0 : index
    %67 = vector.load %arg9[%c1_71, %c0_72, %c0_73] : memref<5x160x128xf32, #tpu.memory_space<vmem>>, vector<1x160x128xf32>
    %68 = vector.shape_cast %67 : vector<1x160x128xf32> to vector<160x128xf32>
    %cst_74 = arith.constant dense<0.000000e+00> : vector<2x128xf32>
    %69 = tpu.matmul %66, %68, %cst_74 {dimension_numbers = #tpu.dot_dimension_numbers<[1], [0], [0], [1], [0, 0, 1, 1], [], []>} : vector<2x160xf32>, vector<160x128xf32>, vector<2x128xf32> -> vector<2x128xf32>
    %70 = arith.addf %63, %69 : vector<2x128xf32>
    %c2_75 = arith.constant 2 : index
    %c0_76 = arith.constant 0 : index
    %c0_77 = arith.constant 0 : index
    %71 = vector.load %arg8[%c2_75, %c0_76, %c0_77] : memref<5x2x10xf32, #tpu.memory_space<vmem>>, vector<1x2x10xf32>
    %72 = vector.shape_cast %71 : vector<1x2x10xf32> to vector<2x10xf32>
    %cst_78 = arith.constant dense<0.000000e+00> : vector<2x160xf32>
    %73 = tpu.matmul %72, %57, %cst_78 {dimension_numbers = #tpu.dot_dimension_numbers<[1], [0], [0], [1], [0, 0, 1, 1], [], []>} : vector<2x10xf32>, vector<10x160xf32>, vector<2x160xf32> -> vector<2x160xf32>
    %c2_79 = arith.constant 2 : index
    %c0_80 = arith.constant 0 : index
    %c0_81 = arith.constant 0 : index
    %74 = vector.load %arg9[%c2_79, %c0_80, %c0_81] : memref<5x160x128xf32, #tpu.memory_space<vmem>>, vector<1x160x128xf32>
    %75 = vector.shape_cast %74 : vector<1x160x128xf32> to vector<160x128xf32>
    %cst_82 = arith.constant dense<0.000000e+00> : vector<2x128xf32>
    %76 = tpu.matmul %73, %75, %cst_82 {dimension_numbers = #tpu.dot_dimension_numbers<[1], [0], [0], [1], [0, 0, 1, 1], [], []>} : vector<2x160xf32>, vector<160x128xf32>, vector<2x128xf32> -> vector<2x128xf32>
    %77 = arith.addf %70, %76 : vector<2x128xf32>
    %c3_83 = arith.constant 3 : index
    %c0_84 = arith.constant 0 : index
    %c0_85 = arith.constant 0 : index
    %78 = vector.load %arg8[%c3_83, %c0_84, %c0_85] : memref<5x2x10xf32, #tpu.memory_space<vmem>>, vector<1x2x10xf32>
    %79 = vector.shape_cast %78 : vector<1x2x10xf32> to vector<2x10xf32>
    %cst_86 = arith.constant dense<0.000000e+00> : vector<2x160xf32>
    %80 = tpu.matmul %79, %57, %cst_86 {dimension_numbers = #tpu.dot_dimension_numbers<[1], [0], [0], [1], [0, 0, 1, 1], [], []>} : vector<2x10xf32>, vector<10x160xf32>, vector<2x160xf32> -> vector<2x160xf32>
    %c3_87 = arith.constant 3 : index
    %c0_88 = arith.constant 0 : index
    %c0_89 = arith.constant 0 : index
    %81 = vector.load %arg9[%c3_87, %c0_88, %c0_89] : memref<5x160x128xf32, #tpu.memory_space<vmem>>, vector<1x160x128xf32>
    %82 = vector.shape_cast %81 : vector<1x160x128xf32> to vector<160x128xf32>
    %cst_90 = arith.constant dense<0.000000e+00> : vector<2x128xf32>
    %83 = tpu.matmul %80, %82, %cst_90 {dimension_numbers = #tpu.dot_dimension_numbers<[1], [0], [0], [1], [0, 0, 1, 1], [], []>} : vector<2x160xf32>, vector<160x128xf32>, vector<2x128xf32> -> vector<2x128xf32>
    %84 = arith.addf %77, %83 : vector<2x128xf32>
    %c4 = arith.constant 4 : index
    %c0_91 = arith.constant 0 : index
    %c0_92 = arith.constant 0 : index
    %85 = vector.load %arg8[%c4, %c0_91, %c0_92] : memref<5x2x10xf32, #tpu.memory_space<vmem>>, vector<1x2x10xf32>
    %86 = vector.shape_cast %85 : vector<1x2x10xf32> to vector<2x10xf32>
    %cst_93 = arith.constant dense<0.000000e+00> : vector<2x160xf32>
    %87 = tpu.matmul %86, %57, %cst_93 {dimension_numbers = #tpu.dot_dimension_numbers<[1], [0], [0], [1], [0, 0, 1, 1], [], []>} : vector<2x10xf32>, vector<10x160xf32>, vector<2x160xf32> -> vector<2x160xf32>
    %c4_94 = arith.constant 4 : index
    %c0_95 = arith.constant 0 : index
    %c0_96 = arith.constant 0 : index
    %88 = vector.load %arg9[%c4_94, %c0_95, %c0_96] : memref<5x160x128xf32, #tpu.memory_space<vmem>>, vector<1x160x128xf32>
    %89 = vector.shape_cast %88 : vector<1x160x128xf32> to vector<160x128xf32>
    %cst_97 = arith.constant dense<0.000000e+00> : vector<2x128xf32>
    %90 = tpu.matmul %87, %89, %cst_97 {dimension_numbers = #tpu.dot_dimension_numbers<[1], [0], [0], [1], [0, 0, 1, 1], [], []>} : vector<2x160xf32>, vector<160x128xf32>, vector<2x128xf32> -> vector<2x128xf32>
    %91 = arith.addf %84, %90 : vector<2x128xf32>
    %c0_98 = arith.constant 0 : index
    %c0_99 = arith.constant 0 : index
    %92 = vector.load %arg10[%c0_98, %c0_99] : memref<1x128xf32, #tpu.memory_space<vmem>>, vector<1x128xf32>
    %93 = vector.broadcast %92 : vector<1x128xf32> to vector<2x128xf32>
    %94 = arith.addf %91, %93 : vector<2x128xf32>
    %cst_100 = arith.constant 0.000000e+00 : f32
    %95 = vector.broadcast %cst_100 : f32 to vector<2x128xf32>
    %96 = arith.maximumf %94, %95 : vector<2x128xf32>
    %c0_101 = arith.constant 0 : index
    %c0_102 = arith.constant 0 : index
    %97 = vector.load %arg13[%c0_101, %c0_102] : memref<2x128xf32, #tpu.memory_space<vmem>>, vector<2x128xf32>
    tpu.vector_store %arg13[%c0_101, %c0_102], %96 {strides = array<i32>} : memref<2x128xf32, #tpu.memory_space<vmem>>, vector<2x128xf32>,
    %c0_103 = arith.constant 0 : index
    %c0_104 = arith.constant 0 : index
    %98 = vector.load %arg11[%c0_103, %c0_104] : memref<1x128xf32, #tpu.memory_space<vmem>>, vector<1x128xf32>
    %99 = vector.broadcast %98 : vector<1x128xf32> to vector<2x128xf32>
    %100 = arith.mulf %96, %99 : vector<2x128xf32>
    %cst_105 = arith.constant dense<0.000000e+00> : vector<2xf32>
    %101 = vector.multi_reduction <add>, %100, %cst_105 [1] : vector<2x128xf32> to vector<2xf32>
    %102 = vector.shape_cast %101 : vector<2xf32> to vector<2x1xf32>
    %c0_106 = arith.constant 0 : index
    %c0_107 = arith.constant 0 : index
    %103 = vector.load %arg12[%c0_106, %c0_107] : memref<1x1xf32, #tpu.memory_space<vmem>>, vector<1x1xf32>
    %104 = vector.broadcast %103 : vector<1x1xf32> to vector<2x1xf32>
    %105 = arith.addf %102, %104 : vector<2x1xf32>
    %c0_108 = arith.constant 0 : index
    %c0_109 = arith.constant 0 : index
    %106 = vector.load %arg14[%c0_108, %c0_109] : memref<2x1xf32, #tpu.memory_space<vmem>>, vector<2x1xf32>
    tpu.vector_store %arg14[%c0_108, %c0_109], %105 {strides = array<i32>} : memref<2x1xf32, #tpu.memory_space<vmem>>, vector<2x1xf32>,
    return
  }
  func.func @transform_0(%arg0: i32) -> (i32, i32) {
    %c0_i32 = arith.constant 0 : i32
    %c0_i32_0 = arith.constant 0 : i32
    %c0_i32_1 = arith.constant 0 : i32
    return %c0_i32, %c0_i32_0 : i32, i32
  }
  func.func @transform_1(%arg0: i32) -> (i32, i32, i32) {
    %c0_i32 = arith.constant 0 : i32
    %c0_i32_0 = arith.constant 0 : i32
    %c0_i32_1 = arith.constant 0 : i32
    %c0_i32_2 = arith.constant 0 : i32
    return %c0_i32, %c0_i32_0, %c0_i32_1 : i32, i32, i32
  }
  func.func @transform_2(%arg0: i32) -> (i32, i32, i32) {
    %c0_i32 = arith.constant 0 : i32
    %c0_i32_0 = arith.constant 0 : i32
    %c0_i32_1 = arith.constant 0 : i32
    %c0_i32_2 = arith.constant 0 : i32
    return %c0_i32, %c0_i32_0, %c0_i32_1 : i32, i32, i32
  }
  func.func @transform_3(%arg0: i32) -> (i32, i32) {
    %c0_i32 = arith.constant 0 : i32
    %c0_i32_0 = arith.constant 0 : i32
    %c0_i32_1 = arith.constant 0 : i32
    return %c0_i32, %c0_i32_0 : i32, i32
  }
  func.func @transform_4(%arg0: i32) -> (i32, i32, i32) {
    %c0_i32 = arith.constant 0 : i32
    %c0_i32_0 = arith.constant 0 : i32
    %c0_i32_1 = arith.constant 0 : i32
    %c0_i32_2 = arith.constant 0 : i32
    return %c0_i32, %c0_i32_0, %c0_i32_1 : i32, i32, i32
  }
  func.func @transform_5(%arg0: i32) -> (i32, i32, i32) {
    %c0_i32 = arith.constant 0 : i32
    %c0_i32_0 = arith.constant 0 : i32
    %c0_i32_1 = arith.constant 0 : i32
    %c0_i32_2 = arith.constant 0 : i32
    return %c0_i32, %c0_i32_0, %c0_i32_1 : i32, i32, i32
  }
  func.func @transform_6(%arg0: i32) -> (i32, i32) {
    %c0_i32 = arith.constant 0 : i32
    %c0_i32_0 = arith.constant 0 : i32
    %c0_i32_1 = arith.constant 0 : i32
    return %c0_i32, %c0_i32_0 : i32, i32
  }
  func.func @transform_7(%arg0: i32) -> (i32, i32, i32) {
    %c0_i32 = arith.constant 0 : i32
    %c0_i32_0 = arith.constant 0 : i32
    %c0_i32_1 = arith.constant 0 : i32
    %c0_i32_2 = arith.constant 0 : i32
    return %c0_i32, %c0_i32_0, %c0_i32_1 : i32, i32, i32
  }
  func.func @transform_8(%arg0: i32) -> (i32, i32, i32) {
    %c0_i32 = arith.constant 0 : i32
    %c0_i32_0 = arith.constant 0 : i32
    %c0_i32_1 = arith.constant 0 : i32
    %c0_i32_2 = arith.constant 0 : i32
    return %c0_i32, %c0_i32_0, %c0_i32_1 : i32, i32, i32
  }
  func.func @transform_9(%arg0: i32) -> (i32, i32) {
    %c0_i32 = arith.constant 0 : i32
    %c0_i32_0 = arith.constant 0 : i32
    %c0_i32_1 = arith.constant 0 : i32
    return %c0_i32, %c0_i32_0 : i32, i32
  }
  func.func @transform_10(%arg0: i32) -> (i32, i32) {
    %c0_i32 = arith.constant 0 : i32
    %c0_i32_0 = arith.constant 0 : i32
    %c0_i32_1 = arith.constant 0 : i32
    return %c0_i32, %c0_i32_0 : i32, i32
  }
  func.func @transform_11(%arg0: i32) -> (i32, i32) {
    %c0_i32 = arith.constant 0 : i32
    %c0_i32_0 = arith.constant 0 : i32
    %c0_i32_1 = arith.constant 0 : i32
    return %c0_i32, %c0_i32_0 : i32, i32
  }
  func.func @transform_12(%arg0: i32) -> (i32, i32) {
    %c0_i32 = arith.constant 0 : i32
    %c0_i32_0 = arith.constant 0 : i32
    %c0_i32_1 = arith.constant 0 : i32
    return %c0_i32, %c0_i32_0 : i32, i32
  }
  func.func @transform_13(%arg0: i32) -> (i32, i32) {
    %c0_i32 = arith.constant 0 : i32
    %c0_i32_0 = arith.constant 0 : i32
    %c0_i32_1 = arith.constant 0 : i32
    return %c0_i32, %c0_i32_0 : i32, i32
  }
}

</mosaic_0001>

<bundles_post_ra>
// kernel: branch_cnn_forward.1
= control target key start
LH: loop header
LB: loop body
LE: loop exit
PB: predicated region body
PF: predicated region fallthrough
CT: control target
= control target key end

     0   :  { %vm51_vm0 = vcmask 261120   ;;  %vm234_vm1 = vcmask 523264   ;;  %vm762_vm2 = vcmask 113664   ;;  %vm769_vm3 = vcmask 1045504   ;;  %s4098_s0 = inlined_call_operand.vmem [shape: f32[32,64], index: 0, kind: input, shape index: {}]   ;;  %s4099_s1 = inlined_call_operand.vmem [shape: f32[4,14,32], index: 1, kind: input, shape index: {}]   ;;  %s4100_s2 = inlined_call_operand.vmem [shape: f32[4,64,112], index: 2, kind: input, shape index: {}]   ;;  %s4101_s4 = inlined_call_operand.vmem [shape: f32[3,10,14], index: 4, kind: input, shape index: {}]   ;;  %s4102_s3 = inlined_call_operand.vmem [shape: f32[1,112], index: 3, kind: input, shape index: {}]   ;;  %s4103_s5 = inlined_call_operand.vmem [shape: f32[3,112,160], index: 5, kind: input, shape index: {}]   ;;  %s4104_s8 = inlined_call_operand.vmem [shape: f32[5,160,128], index: 8, kind: input, shape index: {}]   ;;  %s4105_s6 = inlined_call_operand.vmem [shape: f32[1,160], index: 6, kind: input, shape index: {}]   ;;  %s4106_s7 = inlined_call_operand.vmem [shape: f32[5,2,10], index: 7, kind: input, shape index: {}]   ;;  %s4107_s11 = inlined_call_operand.<no memory space> [shape: f32[1,1], index: 11, kind: input, shape index: {}]   ;;  %s4108_s9 = inlined_call_operand.vmem [shape: f32[1,128], index: 9, kind: input, shape index: {}]   ;;  %s4109_s10 = inlined_call_operand.vmem [shape: f32[1,128], index: 10, kind: input, shape index: {}]   ;;  %s4110_s12 = inlined_call_operand.vmem [shape: f32[2,128], index: 12, kind: output, shape index: {0}]   ;;  %s4111_s13 = inlined_call_operand.vmem [shape: f32[2,1], index: 13, kind: output, shape index: {1}]  }
   0x1   :  { %v45_v0 = vld [vmem:[%s4098_s0] sm:$0xff]  ;;  %v46_v1 = vld [vmem:[%s4098_s0 + $0x8] sm:$0xff]  ;;  %v47_v2 = vld [vmem:[%s4098_s0 + $0x10] sm:$0xff]  ;;  %vm3115_vm4 = vmmov 1   ;;  %vm989_vm6 = vcmask 916480   ;;  %vm1381_vm7 = vcmask 1041408  }
   0x2   :  { %v2720_v3 = vpack.c.bf16 %v46_v1, %v45_v0  ;;  %v48_v4 = vld [vmem:[%s4098_s0 + $0x18] sm:$0xff]  ;;  %v49_v5 = vld [vmem:[%s4099_s1] sm:$0xff]  ;;  %v2281_v8 = vld [vmem:[%s4100_s2 + $0x48] sm:$0xff]  ;;  %vm1377_vm9 = vcmask 80896   ;;  %vm2264_vm10 = vcmask 1024  }
   0x3   :  { %v2724_v6 = vpack.c.bf16 %v48_v4, %v47_v2  ;;  %2587 = vmatprep.mubr.msk.f32.mxu1 %vm51_vm0, %v49_v5  ;;  %v2280_v7 = vld [vmem:[%s4100_s2 + $0x40] sm:$0xff]  ;;  %v2282_v9 = vld [vmem:[%s4100_s2 + $0x50] sm:$0xff]  ;;  %v2283_v11 = vld [vmem:[%s4100_s2 + $0x58] sm:$0xff] }
   0x4   :  { %2721 = vmatprep.subr.bf16.mxu1 %v2720_v3  ;;  %v2736_v10 = vpack.c.bf16 %v2281_v8, %v2280_v7  ;;  %v2740_v12 = vpack.c.bf16 %v2283_v11, %v2282_v9  ;;  %v50_v13 = vld [vmem:[%s4099_s1 + $0x8] sm:$0x3f]  ;;  %v2276_v14 = vld [vmem:[%s4099_s1 + $0x10] sm:$0xff]  ;;  %v2277_v15 = vld [vmem:[%s4099_s1 + $0x18] sm:$0x3f] }
   0x5   :  { %2723 = vmatpush3.bf16.msra.mxu1 %v2720_v3  ;;  %v2292_v16 = vld [vmem:[%s4099_s1 + $0x20] sm:$0xff]  ;;  %v2293_v17 = vld [vmem:[%s4099_s1 + $0x28] sm:$0x3f]  ;;  %v2306_v18 = vld [vmem:[%s4099_s1 + $0x30] sm:$0xff] }
   0x6   :  { %2725 = vmatprep.subr.bf16.mxu1 %v2724_v6  ;;  %2737 = vmatprep.subr.bf16.mxu0 %v2736_v10  ;;  %v2307_v19 = vld [vmem:[%s4099_s1 + $0x38] sm:$0x3f]  ;;  %v2284_v20 = vld [vmem:[%s4100_s2 + $0x60] sm:$0xff]  ;;  %v2285_v21 = vld [vmem:[%s4100_s2 + $0x68] sm:$0xff] }
   0x7   :  { %2739 = vmatpush3.bf16.msra.mxu0 %v2736_v10  ;;  %v2744_v22 = vpack.c.bf16 %v2285_v21, %v2284_v20  ;;  %v2286_v23 = vld [vmem:[%s4100_s2 + $0x70] sm:$0xff]  ;;  %v2287_v24 = vld [vmem:[%s4100_s2 + $0x78] sm:$0xff]  ;;  %v133_v26 = vld [vmem:[%s4100_s2] sm:$0xff] }
   0x8   :  { %2741 = vmatprep.subr.bf16.mxu0 %v2740_v12  ;;  %v2748_v25 = vpack.c.bf16 %v2287_v24, %v2286_v23  ;;  %v134_v27 = vld [vmem:[%s4100_s2 + $0x8] sm:$0xff]  ;;  %v135_v31 = vld [vmem:[%s4100_s2 + $0x10] sm:$0xff]  ;;  %v136_v32 = vld [vmem:[%s4100_s2 + $0x18] sm:$0xff] }
   0x9   :  { %2727 = vmatpush3.bf16.msra.mxu1 %v2724_v6  ;;  %v2752_v28 = vpack.c.bf16 %v134_v27, %v133_v26  ;;  %v2756_v35 = vpack.c.bf16 %v136_v32, %v135_v31  ;;  %v137_v36 = vld [vmem:[%s4100_s2 + $0x20] sm:$0xff]  ;;  %v138_v37 = vld [vmem:[%s4100_s2 + $0x28] sm:$0xff]  ;;  %v139_v39 = vld [vmem:[%s4100_s2 + $0x30] sm:$0xff] }
   0xa   :  { %2729 = vmatprep.subr.bf16.mxu1 %v2720_v3  ;;  %v2760_v38 = vpack.c.bf16 %v138_v37, %v137_v36  ;;  %v140_v40 = vld [vmem:[%s4100_s2 + $0x38] sm:$0xff]  ;;  %v2296_v44 = vld [vmem:[%s4100_s2 + $0x80] sm:$0xff]  ;;  %v2297_v45 = vld [vmem:[%s4100_s2 + $0x88] sm:$0xff] }
   0xb   :  { %2743 = vmatpush3.bf16.msra.mxu0 %v2740_v12  ;;  %v2764_v42 = vpack.c.bf16 %v140_v40, %v139_v39  ;;  %v2776_v46 = vpack.c.bf16 %v2297_v45, %v2296_v44  ;;  %v2298_v47 = vld [vmem:[%s4100_s2 + $0x90] sm:$0xff]  ;;  %v2299_v48 = vld [vmem:[%s4100_s2 + $0x98] sm:$0xff]  ;;  %v2300_v52 = vld [vmem:[%s4100_s2 + $0xa0] sm:$0xff] }
   0xc   :  { %2588 = vmatmul.mubr.msk.f32.vlgmr.msra.gmra.mrb[0].mxu1 %vm51_vm0, %v50_v13  ;;  %2745 = vmatprep.subr.bf16.mxu0 %v2744_v22  ;;  %v2780_v50 = vpack.c.bf16 %v2299_v48, %v2298_v47  ;;  %v2301_v53 = vld [vmem:[%s4100_s2 + $0xa8] sm:$0xff]  ;;  %v2302_v55 = vld [vmem:[%s4100_s2 + $0xb0] sm:$0xff]  ;;  %v2303_v56 = vld [vmem:[%s4100_s2 + $0xb8] sm:$0xff] }
   0xd   :  { %2731 = vmatpush3.bf16.msra.mxu1 %v2720_v3  ;;  %2598 = vmatprep.mubr.msk.f32.mxu1 %vm51_vm0, %v2276_v14  ;;  %v2784_v54 = vpack.c.bf16 %v2301_v53, %v2300_v52  ;;  %v2788_v57 = vpack.c.bf16 %v2303_v56, %v2302_v55  ;;  %v2310_v58 = vld [vmem:[%s4100_s2 + $0xc0] sm:$0xff]  ;;  %v2311_v59 = vld [vmem:[%s4100_s2 + $0xc8] sm:$0xff]  ;;  %v2312_v61 = vld [vmem:[%s4100_s2 + $0xd0] sm:$0xff] }
   0xe   :  { %2733 = vmatprep.subr.bf16.mxu1 %v2724_v6  ;;  %v2800_v60 = vpack.c.bf16 %v2311_v59, %v2310_v58  ;;  %v2313_v62 = vld [vmem:[%s4100_s2 + $0xd8] sm:$0xff]  ;;  %v2314_v0 = vld [vmem:[%s4100_s2 + $0xe0] sm:$0xff]  ;;  %v2315_v1 = vld [vmem:[%s4100_s2 + $0xe8] sm:$0xff] }
   0xf   :  { %2747 = vmatpush3.bf16.msra.mxu0 %v2744_v22  ;;  %v2804_v63 = vpack.c.bf16 %v2313_v62, %v2312_v61  ;;  %v2808_v2 = vpack.c.bf16 %v2315_v1, %v2314_v0  ;;  %v2317_v4 = vld [vmem:[%s4100_s2 + $0xf8] sm:$0xff]  ;;  %v2361_v7 = vld [vmem:[%s4101_s4 + $0x20] sm:$0xff]  ;;  %vm3348_vm5 = vmpackc.low %vm769_vm3, %vm3115_vm4 }
  0x10   :  { %2749 = vmatprep.subr.bf16.mxu0 %v2748_v25  ;;  %v2320_v8 = vld [vmem:[%s4102_s3] ss:$0 sm:$0xff]  ;;  %v2362_v20 = vld [vmem:[%s4101_s4 + $0x28] sm:$0x3]  ;;  %v2324_v21 = vld [vmem:[%s4101_s4 + $0x10] sm:$0xff] }
  0x11   :  { %2735 = vmatpush3.bf16.msra.mxu1 %v2724_v6  ;;  %v2329_v23 = vld [vmem:[%s4103_s5 + $0xe0] sm:$0xff]  ;;  %v2331_v24 = vld [vmem:[%s4103_s5 + $0xf0] sm:$0xff]  ;;  %v2336_v26 = vld [vmem:[%s4103_s5 + $0x118] sm:$0xff] }
  0x12   :  { %2769 = vmatprep.subr.bf16.mxu1 %v2720_v3  ;;  %v2325_v27 = vld [vmem:[%s4101_s4 + $0x18] sm:$0x3]  ;;  %v2335_v31 = vld [vmem:[%s4103_s5 + $0x110] sm:$0xff]  ;;  %v2338_v32 = vld [vmem:[%s4103_s5 + $0x128] sm:$0xff] }
  0x13   :  { %2751 = vmatpush3.bf16.msra.mxu0 %v2748_v25  ;;  %v2334_v25 = vld [vmem:[%s4103_s5 + $0x108] sm:$0xff]  ;;  %v2337_v36 = vld [vmem:[%s4103_s5 + $0x120] sm:$0xff]  ;;  %v2339_v37 = vld [vmem:[%s4103_s5 + $0x130] sm:$0xff] }
  0x14   :  { %2599 = vmatmul.mubr.msk.f32.vlgmr.msra.gmra.mrb[2].mxu1 %vm51_vm0, %v2277_v15  ;;  %2753 = vmatprep.subr.bf16.mxu0 %v2752_v28  ;;  %v2344_v39 = vld [vmem:[%s4103_s5 + $0x158] sm:$0xff]  ;;  %v2838_v40 = vpack.c.bf16 %v2339_v37, %v2337_v36  ;;  %v2346_v44 = vld [vmem:[%s4103_s5 + $0x168] sm:$0xff]  ;;  %v2345_v48 = vld [vmem:[%s4103_s5 + $0x160] sm:$0xff] }
  0x15   :  { %2771 = vmatpush3.bf16.msra.mxu1 %v2720_v3  ;;  %2647 = vmatprep.mubr.msk.f32.mxu1 %vm51_vm0, %v2292_v16  ;;  %v2348_v45 = vld [vmem:[%s4103_s5 + $0x178] sm:$0xff]  ;;  %v2351_v55 = vld [vmem:[%s4103_s5 + $0x190] sm:$0xff]  ;;  %vm3732_vm8 = vmpackc.low %vm1381_vm7, %vm3115_vm4 }
  0x16   :  { %2773 = vmatprep.subr.bf16.mxu1 %v2724_v6  ;;  %v2844_v47 = vpack.c.bf16 %v2348_v45, %v2346_v44  ;;  %v2356_v58 = vld [vmem:[%s4103_s5 + $0x1b8] sm:$0xff]  ;;  %v2355_v61 = vld [vmem:[%s4103_s5 + $0x1b0] sm:$0xff]  ;;  %v872_v45 = vld [vmem:[%s4103_s5 + $0xc0] sm:$0xff] }
  0x17   :  { %v851_v0 = vld [vmem:[%s4103_s5 + $0x18] sm:$0xff]  ;;  %v854_v15 = vld [vmem:[%s4103_s5 + $0x30] sm:$0xff] }
  0x18   :  { %v871_v36 = vld [vmem:[%s4103_s5 + $0xb8] sm:$0xff] }
  0x19   :  { %2775 = vmatpush3.bf16.msra.mxu1 %v2724_v6 }
  0x1a   :  { %2793 = vmatprep.subr.bf16.mxu1 %v2720_v3 }
  0x1c   :  { %2648 = vmatmul.mubr.msk.f32.vlgmr.msra.gmra.mrb[4].mxu1 %vm51_vm0, %v2293_v17  ;;  %v2330_v17 = vld [vmem:[%s4103_s5 + $0xe8] sm:$0xff] }
  0x1d   :  { %2795 = vmatpush3.bf16.msra.mxu1 %v2720_v3  ;;  %2677 = vmatprep.mubr.msk.f32.mxu1 %vm51_vm0, %v2306_v18  ;;  %v2316_v3 = vld [vmem:[%s4100_s2 + $0xf0] sm:$0xff]  ;;  %v2332_v18 = vld [vmem:[%s4103_s5 + $0xf8] sm:$0xff] }
  0x1e   :  { %2797 = vmatprep.subr.bf16.mxu1 %v2724_v6  ;;  %v2812_v5 = vpack.c.bf16 %v2317_v4, %v2316_v3  ;;  %v2828_v22 = vpack.c.bf16 %v2332_v18, %v2330_v17  ;;  %v848_v4 = vld [vmem:[%s4103_s5] sm:$0xff]  ;;  %v857_v17 = vld [vmem:[%s4103_s5 + $0x48] sm:$0xff]  ;;  %v859_v18 = vld [vmem:[%s4103_s5 + $0x58] sm:$0xff] }
  0x21   :  { %2799 = vmatpush3.bf16.msra.mxu1 %v2724_v6  ;;  %v760_v6 = vld [vmem:[%s4101_s4] sm:$0xff] }
  0x24   :  { %2678 = vmatmul.mubr.msk.f32.vlgmr.msra.gmra.mrb[6].mxu1 %vm51_vm0, %v2307_v19  ;;  %v761_v19 = vld [vmem:[%s4101_s4 + $0x8] sm:$0x3] }
  0x25   :  { %2703 = vmatprep.mubr.msk.f32.mxu1 %vm762_vm2, %v760_v6 }
  0xdf   :  { %v2589_v29 = vpop.f32.mrb[0].mxu1 }
  0xe0   :  { %v124_v30 = vpop.f32.mrb[1].mxu1 }
  0xe7   :  { %v2600_v33 = vpop.f32.mrb[2].mxu1 }
  0xe8   :  { %v216_v34 = vpop.f32.mrb[3].mxu1 }
  0xe9   :  { %2617 = vmatprep.mubr.msk.f32.mxu0 %vm234_vm1, %v216_v34 }
  0xea   :  { %2618 = vmatmul.mubr.msk.f32.vlgmr.msra.gmra.mrb[0].mxu0 %vm234_vm1, %v2600_v33  ;;  %v2340_v33 = vld [vmem:[%s4103_s5 + $0x138] sm:$0xff] }
  0xeb   :  { %2755 = vmatpush3.bf16.msra.mxu0 %v2752_v28  ;;  %2636 = vmatprep.mubr.msk.f32.mxu0 %vm234_vm1, %v124_v30  ;;  %v2830_v28 = vpack.c.bf16 %v2331_v24, %v2329_v23  ;;  %v2333_v30 = vld [vmem:[%s4103_s5 + $0x100] sm:$0xff]  ;;  %v861_v23 = vld [vmem:[%s4103_s5 + $0x68] sm:$0xff]  ;;  %v863_v24 = vld [vmem:[%s4103_s5 + $0x78] sm:$0xff] }
  0xec   :  { %2757 = vmatprep.subr.bf16.mxu0 %v2756_v35  ;;  %v2834_v34 = vpack.c.bf16 %v2335_v31, %v2333_v30  ;;  %v867_v30 = vld [vmem:[%s4103_s5 + $0x98] sm:$0xff] }
  0xef   :  { %2759 = vmatpush3.bf16.msra.mxu0 %v2756_v35  ;;  %v2649_v41 = vpop.f32.mrb[4].mxu1  ;;  %v2836_v35 = vpack.c.bf16 %v2340_v33, %v2338_v32  ;;  %v864_v33 = vld [vmem:[%s4103_s5 + $0x80] sm:$0xff] }
  0xf0   :  { %2761 = vmatprep.subr.bf16.mxu0 %v2760_v38  ;;  %v472_v43 = vpop.f32.mrb[5].mxu1 }
  0xf3   :  { %2763 = vmatpush3.bf16.msra.mxu0 %v2760_v38  ;;  %v2342_v38 = vld [vmem:[%s4103_s5 + $0x148] sm:$0xff] }
  0xf4   :  { %2765 = vmatprep.subr.bf16.mxu0 %v2764_v42 }
  0xf7   :  { %2767 = vmatpush3.bf16.msra.mxu0 %v2764_v42  ;;  %v2679_v49 = vpop.f32.mrb[6].mxu1  ;;  %v2341_v42 = vld [vmem:[%s4103_s5 + $0x140] sm:$0xff] }
  0xf8   :  { %2777 = vmatprep.subr.bf16.mxu0 %v2776_v46  ;;  %v648_v51 = vpop.f32.mrb[7].mxu1 }
  0xfa   :  { %2637 = vmatmul.mubr.msk.f32.vlgmr.msra.gmra.mrb[0].mxu0 %vm234_vm1, %v2589_v29  ;;  %v2832_v29 = vpack.c.bf16 %v2336_v26, %v2334_v25  ;;  %v2868_v26 = vpack.c.bf16 %v863_v24, %v861_v23  ;;  %v2393_v23 = vld [vmem:[%s4103_s5 + $0x298] sm:$0xff] }
  0xfb   :  { %2779 = vmatpush3.bf16.msra.mxu0 %v2776_v46  ;;  %2666 = vmatprep.mubr.msk.f32.mxu0 %vm234_vm1, %v472_v43  ;;  %v2343_v43 = vld [vmem:[%s4103_s5 + $0x150] sm:$0xff] }
  0xfc   :  { %2781 = vmatprep.subr.bf16.mxu0 %v2780_v50  ;;  %v2842_v46 = vpack.c.bf16 %v2343_v43, %v2341_v42  ;;  %v875_v42 = vld [vmem:[%s4103_s5 + $0xd8] sm:$0xff] }
  0xff   :  { %2783 = vmatpush3.bf16.msra.mxu0 %v2780_v50  ;;  %v2350_v50 = vld [vmem:[%s4103_s5 + $0x188] sm:$0xff] }
 0x100   :  { %2785 = vmatprep.subr.bf16.mxu0 %v2784_v54 }
 0x103   :  { %2787 = vmatpush3.bf16.msra.mxu0 %v2784_v54  ;;  %v2349_v54 = vld [vmem:[%s4103_s5 + $0x180] sm:$0xff] }
 0x104   :  { %2789 = vmatprep.subr.bf16.mxu0 %v2788_v57  ;;  %v2850_v56 = vpack.c.bf16 %v2351_v55, %v2349_v54  ;;  %v2373_v54 = vld [vmem:[%s4103_s5 + $0x1f8] sm:$0xff] }
 0x107   :  { %2791 = vmatpush3.bf16.msra.mxu0 %v2788_v57  ;;  %v2354_v57 = vld [vmem:[%s4103_s5 + $0x1a8] sm:$0xff] }
 0x108   :  { %2801 = vmatprep.subr.bf16.mxu0 %v2800_v60  ;;  %v2852_v59 = vpack.c.bf16 %v2356_v58, %v2354_v57  ;;  %v2370_v57 = vld [vmem:[%s4103_s5 + $0x1e0] sm:$0xff]  ;;  %v2372_v58 = vld [vmem:[%s4103_s5 + $0x1f0] sm:$0xff] }
 0x10a   :  { %2667 = vmatmul.mubr.msk.f32.vlgmr.msra.gmra.mrb[0].mxu0 %vm234_vm1, %v2649_v41  ;;  %v2840_v41 = vpack.c.bf16 %v2344_v39, %v2342_v38  ;;  %v868_v39 = vld [vmem:[%s4103_s5 + $0xa0] sm:$0xff] }
 0x10b   :  { %2803 = vmatpush3.bf16.msra.mxu0 %v2800_v60  ;;  %2696 = vmatprep.mubr.msk.f32.mxu0 %vm234_vm1, %v648_v51  ;;  %v2352_v51 = vld [vmem:[%s4103_s5 + $0x198] sm:$0xff]  ;;  %v2353_v60 = vld [vmem:[%s4103_s5 + $0x1a0] sm:$0xff] }
 0x10c   :  { %2805 = vmatprep.subr.bf16.mxu0 %v2804_v63  ;;  %v2848_v53 = vpack.c.bf16 %v2352_v51, %v2350_v50  ;;  %v2854_v62 = vpack.c.bf16 %v2355_v61, %v2353_v60  ;;  %v2366_v51 = vld [vmem:[%s4103_s5 + $0x1c0] sm:$0xff]  ;;  %v2377_v60 = vld [vmem:[%s4103_s5 + $0x218] sm:$0xff]  ;;  %v2896_v61 = vpack.c.bf16 %v2372_v58, %v2370_v57  ;;  %v1358_v58 = vlaneseq }
 0x10f   :  { %2807 = vmatpush3.bf16.msra.mxu0 %v2804_v63  ;;  %v849_v63 = vld [vmem:[%s4103_s5 + $0x8] sm:$0xff] }
 0x110   :  { %2809 = vmatprep.subr.bf16.mxu0 %v2808_v2  ;;  %v2856_v1 = vpack.c.bf16 %v851_v0, %v849_v63  ;;  %v2374_v63 = vld [vmem:[%s4103_s5 + $0x200] sm:$0xff]  ;;  %v2376_v0 = vld [vmem:[%s4103_s5 + $0x210] sm:$0xff] }
 0x113   :  { %2811 = vmatpush3.bf16.msra.mxu0 %v2808_v2  ;;  %v3116_v2 = vmov 0.0  }
 0x114   :  { %2813 = vmatprep.subr.bf16.mxu0 %v2812_v5 }
 0x117   :  { %2815 = vmatpush3.bf16.msra.mxu0 %v2812_v5  ;;  %v850_v5 = vld [vmem:[%s4103_s5 + $0x10] sm:$0xff] }
 0x11a   :  { %2697 = vmatmul.mubr.msk.f32.vlgmr.msra.gmra.mrb[0].mxu0 %vm234_vm1, %v2679_v49  ;;  %v2347_v49 = vld [vmem:[%s4103_s5 + $0x170] sm:$0xff] }
 0x11b   :  { %2717 = vmatprep.mubr.msk.f32.mxu0 %vm762_vm2, %v2361_v7  ;;  %v2846_v52 = vpack.c.bf16 %v2347_v49, %v2345_v48  ;;  %v2369_v48 = vld [vmem:[%s4103_s5 + $0x1d8] sm:$0xff] }
 0x1ed   :  { %v2698_v9 = vpop.f32.mrb[0].mxu0 }
 0x1ee   :  { %v757_v10 = vadd.f32 %v2698_v9, %v2320_v8  ;;  %v738_v11 = vpop.f32.mrb[1].mxu0  ;;  %v855_v9 = vld [vmem:[%s4103_s5 + $0x38] sm:$0xff] }
 0x1ef   :  { %v756_v12 = vadd.f32 %v2320_v8, %v738_v11  ;;  %v853_v8 = vld [vmem:[%s4103_s5 + $0x28] sm:$0xff]  ;;  %v2858_v11 = vpack.c.bf16 %v850_v5, %v848_v4  ;;  %v2381_v4 = vld [vmem:[%s4103_s5 + $0x238] sm:$0xff]  ;;  %v2900_v5 = vpack.c.bf16 %v2376_v0, %v2374_v63 }
 0x1f0   :  { %v759_v13 = vmax.f32 %v757_v10, 0.0 }
 0x1f1   :  { %v758_v14 = vmax.f32 %v756_v12, 0.0 }
 0x1f3   :  { %v2816_v16 = vpack.c.bf16 %v759_v13, %v758_v14  ;;  %v2860_v13 = vpack.c.bf16 %v855_v9, %v853_v8  ;;  %v852_v14 = vld [vmem:[%s4103_s5 + $0x20] sm:$0xff]  ;;  %v2380_v9 = vld [vmem:[%s4103_s5 + $0x230] sm:$0xff] }
 0x1f4   :  { %v2378_v8 = vld [vmem:[%s4103_s5 + $0x220] sm:$0xff] }
 0x1f5   :  { %2818 = vmatprep.subr.msk.bf16.mxu1 %vm3348_vm5, %v2816_v16  ;;  %2886 = vmatprep.subr.msk.bf16.mxu0 %vm3348_vm5, %v2816_v16 }
 0x1f6   :  { %2821 = vmatpush3.bf16.msk.msra.mxu1 %vm3348_vm5, %v2816_v16  ;;  %2889 = vmatpush3.bf16.msk.msra.mxu0 %vm3348_vm5, %v2816_v16 }
 0x1f7   :  { %2824 = vmatprep.subr.msk.bf16.mxu1 %vm3348_vm5, %v2816_v16 }
 0x1f9   :  { %2704 = vmatmul.mubr.msk.f32.vlgmr.msra.gmra.mrb[8].mxu1 %vm762_vm2, %v761_v19  ;;  %2718 = vmatmul.mubr.msk.f32.vlgmr.msra.gmra.mrb[2].mxu0 %vm762_vm2, %v2362_v20  ;;  %v2862_v19 = vpack.c.bf16 %v854_v15, %v852_v14  ;;  %v2864_v20 = vpack.c.bf16 %v859_v18, %v857_v17  ;;  %v2382_v14 = vld [vmem:[%s4103_s5 + $0x240] sm:$0xff]  ;;  %v2384_v15 = vld [vmem:[%s4103_s5 + $0x250] sm:$0xff]  ;;  %v2389_v17 = vld [vmem:[%s4103_s5 + $0x278] sm:$0xff] }
 0x1fa   :  { %2827 = vmatpush3.bf16.msk.msra.mxu1 %vm3348_vm5, %v2816_v16  ;;  %2710 = vmatprep.mubr.msk.f32.mxu1 %vm762_vm2, %v2324_v21  ;;  %v856_v21 = vld [vmem:[%s4103_s5 + $0x40] sm:$0xff]  ;;  %v2908_v18 = vpack.c.bf16 %v2384_v15, %v2382_v14 }
 0x1fb   :  { %2829 = vmatprep.subr.bf16.mxu1 %v2828_v22  ;;  %1452 = vmatprep.mubr.f32.mxu0 %v3116_v2  ;;  %v858_v22 = vld [vmem:[%s4103_s5 + $0x50] sm:$0xff] }
 0x1fc   :  { %v2866_v25 = vpack.c.bf16 %v858_v22, %v856_v21  ;;  %v2388_v21 = vld [vmem:[%s4103_s5 + $0x270] sm:$0xff]  ;;  %v2391_v22 = vld [vmem:[%s4103_s5 + $0x288] sm:$0xff] }
 0x1fd   :  { %2711 = vmatmul.mubr.msk.f32.vlgmr.msra.gmra.mrb[10].mxu1 %vm762_vm2, %v2325_v27  ;;  %v860_v27 = vld [vmem:[%s4103_s5 + $0x60] sm:$0xff] }
 0x1fe   :  { %2831 = vmatpush1.bf16.msra.mxu1 %v2830_v28  ;;  %1060 = vmatprep.mubr.f32.mxu1 %v3116_v2  ;;  %v862_v28 = vld [vmem:[%s4103_s5 + $0x70] sm:$0xff] }
 0x1ff   :  { %2833 = vmatprep.subr.bf16.mxu1 %v2832_v29  ;;  %v865_v29 = vld [vmem:[%s4103_s5 + $0x88] sm:$0xff]  ;;  %v2870_v31 = vpack.c.bf16 %v862_v28, %v860_v27  ;;  %v2392_v27 = vld [vmem:[%s4103_s5 + $0x290] sm:$0xff] }
 0x200   :  { %v2872_v32 = vpack.c.bf16 %v867_v30, %v865_v29  ;;  %v1459_v29 = vld [vmem:[%s4104_s8] sm:$0xff]  ;;  %v1460_v30 = vld [vmem:[%s4104_s8 + $0x8] sm:$0xff] }
 0x202   :  { %2835 = vmatpush1.bf16.msra.mxu1 %v2834_v34  ;;  %v866_v34 = vld [vmem:[%s4103_s5 + $0x90] sm:$0xff] }
 0x203   :  { %2837 = vmatprep.subr.bf16.mxu1 %v2836_v35  ;;  %v869_v35 = vld [vmem:[%s4103_s5 + $0xa8] sm:$0xff]  ;;  %v2874_v37 = vpack.c.bf16 %v866_v34, %v864_v33  ;;  %v1461_v33 = vld [vmem:[%s4104_s8 + $0x10] sm:$0xff]  ;;  %v1462_v34 = vld [vmem:[%s4104_s8 + $0x18] sm:$0xff] }
 0x204   :  { %v2876_v38 = vpack.c.bf16 %v871_v36, %v869_v35  ;;  %v2964_v35 = vpack.c.bf16 %v1462_v34, %v1461_v33  ;;  %v1463_v36 = vld [vmem:[%s4104_s8 + $0x20] sm:$0xff] }
 0x205   :  { %v2411_v34 = vld [vmem:[%s4104_s8 + $0xe0] sm:$0xff] }
 0x206   :  { %2839 = vmatpush1.bf16.msra.mxu1 %v2838_v40  ;;  %v870_v40 = vld [vmem:[%s4103_s5 + $0xb0] sm:$0xff] }
 0x207   :  { %2841 = vmatprep.subr.bf16.mxu1 %v2840_v41  ;;  %v873_v41 = vld [vmem:[%s4103_s5 + $0xc8] sm:$0xff]  ;;  %v2878_v43 = vpack.c.bf16 %v870_v40, %v868_v39  ;;  %v1466_v39 = vld [vmem:[%s4104_s8 + $0x38] sm:$0xff] }
 0x208   :  { %v2880_v44 = vpack.c.bf16 %v875_v42, %v873_v41  ;;  %v1468_v41 = vld [vmem:[%s4104_s8 + $0x48] sm:$0xff] }
 0x20a   :  { %2843 = vmatpush1.bf16.msra.mxu1 %v2842_v46  ;;  %v874_v46 = vld [vmem:[%s4103_s5 + $0xd0] sm:$0xff] }
 0x20b   :  { %2845 = vmatprep.subr.bf16.mxu1 %v2844_v47  ;;  %v2367_v47 = vld [vmem:[%s4103_s5 + $0x1c8] sm:$0xff]  ;;  %v2882_v49 = vpack.c.bf16 %v874_v46, %v872_v45  ;;  %v1471_v46 = vld [vmem:[%s4104_s8 + $0x60] sm:$0xff] }
 0x20c   :  { %v2890_v50 = vpack.c.bf16 %v2369_v48, %v2367_v47  ;;  %v1472_v47 = vld [vmem:[%s4104_s8 + $0x68] sm:$0xff] }
 0x20d   :  { %v2979_v48 = vpack.c.bf16 %v1472_v47, %v1471_v46  ;;  %v2421_v47 = vld [vmem:[%s4104_s8 + $0x130] sm:$0xff] }
 0x20e   :  { %2847 = vmatpush1.bf16.msra.mxu1 %v2846_v52  ;;  %v2368_v52 = vld [vmem:[%s4103_s5 + $0x1d0] sm:$0xff] }
 0x20f   :  { %2849 = vmatprep.subr.bf16.mxu1 %v2848_v53  ;;  %v2371_v53 = vld [vmem:[%s4103_s5 + $0x1e8] sm:$0xff]  ;;  %v2892_v55 = vpack.c.bf16 %v2368_v52, %v2366_v51  ;;  %v1475_v52 = vld [vmem:[%s4104_s8 + $0x80] sm:$0xff] }
 0x212   :  { %2851 = vmatpush1.bf16.msra.mxu1 %v2850_v56  ;;  %v2894_v56 = vpack.c.bf16 %v2373_v54, %v2371_v53  ;;  %v1476_v53 = vld [vmem:[%s4104_s8 + $0x88] sm:$0xff] }
 0x213   :  { %2853 = vmatprep.subr.bf16.mxu1 %v2852_v59  ;;  %v2375_v59 = vld [vmem:[%s4103_s5 + $0x208] sm:$0xff]  ;;  %v2985_v54 = vpack.c.bf16 %v1476_v53, %v1475_v52  ;;  %v2454_v52 = vld [vmem:[%s4104_s8 + $0x1e0] sm:$0xff] }
 0x214   :  { %v2455_v53 = vld [vmem:[%s4104_s8 + $0x1e8] sm:$0xff] }
 0x216   :  { %2855 = vmatpush1.bf16.msra.mxu1 %v2854_v62  ;;  %v2898_v62 = vpack.c.bf16 %v2377_v60, %v2375_v59  ;;  %v1359_v59 = vshrl.u32 %v1358_v58, 7  ;;  %v2430_v58 = vld [vmem:[%s4104_s8 + $0x148] sm:$0xff] }
 0x217   :  { %2857 = vmatprep.subr.bf16.mxu1 %v2856_v1  ;;  %v2379_v1 = vld [vmem:[%s4103_s5 + $0x228] sm:$0xff] }
 0x218   :  { %v1360_v60 = vsub.s32 0, %v1359_v59 }
 0x2cc   :  { %v3472_v3 = vpop.f32.mrb[8].mxu1  ;;  %v3480_v6 = vpop.f32.mrb[2].mxu0 }
 0x2cd   :  { %v3482_v7 = vpop.f32.mrb[9].mxu1  ;;  %v3490_v10 = vpop.f32.mrb[3].mxu0 }
 0x2d0   :  { %v2712_v12 = vpop.f32.mrb[10].mxu1 }
 0x2d1   :  { %v951_v16 = vpop.f32.mrb[11].mxu1 }
 0x2d2   :  { %2357 = vmatmul.mubr.msk.f32.vlgmr.msra.gmra.mrb[12].mxu1 %vm989_vm6, %v951_v16  ;;  %v2387_v16 = vld [vmem:[%s4103_s5 + $0x268] sm:$0xff] }
 0x2d3   :  { %2859 = vmatpush1.bf16.msra.mxu1 %v2858_v11  ;;  %1066 = vmatprep.mubr.f32.mxu1 %v3116_v2  ;;  %v2383_v11 = vld [vmem:[%s4103_s5 + $0x248] sm:$0xff] }
 0x2d4   :  { %2861 = vmatprep.subr.bf16.mxu1 %v2860_v13 }
 0x2d6   :  { %2358 = vmatmul.mubr.msk.f32.gmra.mrb[14].mxu1 %vm989_vm6, %v2712_v12  ;;  %v2904_v12 = vpack.c.bf16 %v2380_v9, %v2378_v8 }
 0x2d7   :  { %2863 = vmatpush1.bf16.msra.mxu1 %v2862_v19  ;;  %1143 = vmatprep.mubr.f32.mxu1 %v3116_v2  ;;  %v2910_v19 = vpack.c.bf16 %v2389_v17, %v2387_v16 }
 0x2d8   :  { %2865 = vmatprep.subr.bf16.mxu1 %v2864_v20  ;;  %v2386_v20 = vld [vmem:[%s4103_s5 + $0x260] sm:$0xff] }
 0x2d9   :  { %v2912_v24 = vpack.c.bf16 %v2388_v21, %v2386_v20  ;;  %v2403_v20 = vld [vmem:[%s4104_s8 + $0xa0] sm:$0xff]  ;;  %v2404_v21 = vld [vmem:[%s4104_s8 + $0xa8] sm:$0xff] }
 0x2db   :  { %2867 = vmatpush1.bf16.msra.mxu1 %v2866_v25  ;;  %v2914_v25 = vpack.c.bf16 %v2393_v23, %v2391_v22  ;;  %v2399_v22 = vld [vmem:[%s4106_s7 + $0x2] sm:$0x3]  ;;  %v2931_v23 = vpack.c.bf16 %v2404_v21, %v2403_v20 }
 0x2dc   :  { %2869 = vmatprep.subr.bf16.mxu1 %v2868_v26  ;;  %v2390_v26 = vld [vmem:[%s4103_s5 + $0x280] sm:$0xff] }
 0x2dd   :  { %v2916_v28 = vpack.c.bf16 %v2392_v27, %v2390_v26  ;;  %v2407_v27 = vld [vmem:[%s4104_s8 + $0xc0] sm:$0xff] }
 0x2de   :  { %v2462_v21 = vld [vmem:[%s4104_s8 + $0x220] sm:$0xff] }
 0x2df   :  { %2871 = vmatpush1.bf16.msra.mxu1 %v2870_v31  ;;  %v2961_v31 = vpack.c.bf16 %v1460_v30, %v1459_v29  ;;  %v2409_v30 = vld [vmem:[%s4104_s8 + $0xd0] sm:$0xff] }
 0x2e0   :  { %2873 = vmatprep.subr.bf16.mxu1 %v2872_v32  ;;  %v3117_v32 = vmov 0.0|0.0  }
 0x2e3   :  { %2875 = vmatpush1.bf16.msra.mxu1 %v2874_v37  ;;  %v1464_v37 = vld [vmem:[%s4104_s8 + $0x28] sm:$0xff] }
 0x2e4   :  { %2877 = vmatprep.subr.bf16.mxu1 %v2876_v38  ;;  %v2967_v38 = vpack.c.bf16 %v1464_v37, %v1463_v36  ;;  %v2413_v37 = vld [vmem:[%s4104_s8 + $0xf0] sm:$0xff] }
 0x2e7   :  { %2879 = vmatpush1.bf16.msra.mxu1 %v2878_v43  ;;  %v1469_v43 = vld [vmem:[%s4104_s8 + $0x50] sm:$0xff] }
 0x2e8   :  { %2881 = vmatprep.subr.bf16.mxu1 %v2880_v44  ;;  %v1470_v44 = vld [vmem:[%s4104_s8 + $0x58] sm:$0xff] }
 0x2e9   :  { %v2976_v45 = vpack.c.bf16 %v1470_v44, %v1469_v43  ;;  %v2419_v44 = vld [vmem:[%s4104_s8 + $0x120] sm:$0xff] }
 0x2eb   :  { %2883 = vmatpush1.bf16.msra.mxu1 %v2882_v49  ;;  %v1473_v49 = vld [vmem:[%s4104_s8 + $0x70] sm:$0xff] }
 0x2ec   :  { %2891 = vmatprep.subr.bf16.mxu1 %v2890_v50  ;;  %v1474_v50 = vld [vmem:[%s4104_s8 + $0x78] sm:$0xff] }
 0x2ed   :  { %v2982_v51 = vpack.c.bf16 %v1474_v50, %v1473_v49 }
 0x2ee   :  { %2359 = vmatmul.mubr.msk.f32.vlgmr.msra.gmra.mrb[12].mxu1 %vm989_vm6, %v3482_v7  ;;  %v2902_v7 = vpack.c.bf16 %v2381_v4, %v2379_v1 }
 0x2ef   :  { %2893 = vmatpush1.bf16.msra.mxu1 %v2892_v55  ;;  %1149 = vmatprep.mubr.f32.mxu1 %v3116_v2  ;;  %v1477_v55 = vld [vmem:[%s4104_s8 + $0x90] sm:$0xff] }
 0x2f0   :  { %2895 = vmatprep.subr.bf16.mxu1 %v2894_v56  ;;  %v1478_v56 = vld [vmem:[%s4104_s8 + $0x98] sm:$0xff] }
 0x2f1   :  { %v2988_v57 = vpack.c.bf16 %v1478_v56, %v1477_v55  ;;  %v2450_v55 = vld [vmem:[%s4106_s7 + $0x6] sm:$0x3] }
 0x2f2   :  { %2360 = vmatmul.mubr.msk.f32.gmra.mrb[14].mxu1 %vm989_vm6, %v3472_v3  ;;  %v2385_v3 = vld [vmem:[%s4103_s5 + $0x258] sm:$0xff] }
 0x2f3   :  { %2897 = vmatpush1.bf16.msra.mxu1 %v2896_v61  ;;  %1339 = vmatprep.mubr.f32.mxu1 %v3116_v2  ;;  %v2906_v13 = vpack.c.bf16 %v2385_v3, %v2383_v11  ;;  %v1356_v61 = vld [vmem:[%s4105_s6] sm:$0x3] }
 0x2f4   :  { %2899 = vmatprep.subr.bf16.mxu1 %v2898_v62  ;;  %v1364_v62 = vsub.s32 1, %v1359_v59  ;;  %v1361_v63 = vrot.slane %v1356_v61, %v1360_v60  ;;  %v3033_v59 = vpack.c.bf16 %v2455_v53, %v2454_v52  ;;  %v2456_v60 = vld [vmem:[%s4104_s8 + $0x1f0] sm:$0xff] }
 0x2f5   :  { %v2472_v53 = vld [vmem:[%s4104_s8 + $0x270] sm:$0xff] }
 0x2f6   :  { %v1365_v1 = vrot.slane %v1356_v61, %v1364_v62  ;;  %v2457_v61 = vld [vmem:[%s4104_s8 + $0x1f8] sm:$0xff]  ;;  %v2425_v62 = vld [vmem:[%s4106_s7 + $0x4] sm:$0x3] }
 0x2f7   :  { %2901 = vmatpush1.bf16.msra.mxu1 %v2900_v5 }
 0x2f8   :  { %2903 = vmatprep.subr.bf16.mxu1 %v2902_v7 }
 0x2fb   :  { %2905 = vmatpush1.bf16.msra.mxu1 %v2904_v12 }
 0x2fc   :  { %2907 = vmatprep.subr.bf16.mxu1 %v2906_v13 }
 0x2ff   :  { %2909 = vmatpush1.bf16.msra.mxu1 %v2908_v18 }
 0x300   :  { %2911 = vmatprep.subr.bf16.mxu1 %v2910_v19  ;;  %v1376_v19 = vld [vmem:[%s4106_s7] sm:$0x3] }
 0x303   :  { %2913 = vmatpush1.bf16.msra.mxu1 %v2912_v24  ;;  %v2405_v24 = vld [vmem:[%s4104_s8 + $0xb0] sm:$0xff] }
 0x304   :  { %2915 = vmatprep.subr.bf16.mxu1 %v2914_v25  ;;  %v2406_v25 = vld [vmem:[%s4104_s8 + $0xb8] sm:$0xff] }
 0x305   :  { %v2934_v26 = vpack.c.bf16 %v2406_v25, %v2405_v24  ;;  %v2437_v24 = vld [vmem:[%s4104_s8 + $0x180] sm:$0xff]  ;;  %v2438_v25 = vld [vmem:[%s4104_s8 + $0x188] sm:$0xff] }
 0x307   :  { %2917 = vmatpush1.bf16.msra.mxu1 %v2916_v28  ;;  %v2408_v28 = vld [vmem:[%s4104_s8 + $0xc8] sm:$0xff] }
 0x308   :  { %2960 = vmatprep.subr.bf16.mxu1 %v3117_v32  ;;  %v2937_v29 = vpack.c.bf16 %v2408_v28, %v2407_v27  ;;  %v2464_v27 = vld [vmem:[%s4104_s8 + $0x230] sm:$0xff]  ;;  %v2465_v28 = vld [vmem:[%s4104_s8 + $0x238] sm:$0xff] }
 0x30a   :  { %2394 = vmatmul.mubr.msk.f32.vlgmr.msra.gmra.mrb[12].mxu1 %vm989_vm6, %v3490_v10  ;;  %v1465_v10 = vld [vmem:[%s4104_s8 + $0x30] sm:$0xff] }
 0x30b   :  { %1345 = vmatprep.mubr.f32.mxu1 %v3116_v2  ;;  %2962 = vmatpush1.bf16.msra.mxu1 %v2961_v31  ;;  %v2970_v40 = vpack.c.bf16 %v1466_v39, %v1465_v10  ;;  %v2410_v31 = vld [vmem:[%s4104_s8 + $0xd8] sm:$0xff]  ;;  %v2415_v39 = vld [vmem:[%s4104_s8 + $0x100] sm:$0xff] }
 0x30c   :  { %2963 = vmatprep.subr.bf16.mxu1 %v3117_v32  ;;  %v2940_v33 = vpack.c.bf16 %v2410_v31, %v2409_v30  ;;  %v2439_v30 = vld [vmem:[%s4104_s8 + $0x190] sm:$0xff]  ;;  %v2440_v31 = vld [vmem:[%s4104_s8 + $0x198] sm:$0xff] }
 0x30e   :  { %2395 = vmatmul.mubr.msk.f32.gmra.mrb[14].mxu1 %vm989_vm6, %v3480_v6  ;;  %v1467_v6 = vld [vmem:[%s4104_s8 + $0x40] sm:$0xff] }
 0x30f   :  { %2965 = vmatpush1.bf16.msra.mxu1 %v2964_v35  ;;  %v2973_v42 = vpack.c.bf16 %v1468_v41, %v1467_v6  ;;  %v2412_v35 = vld [vmem:[%s4104_s8 + $0xe8] sm:$0xff]  ;;  %v2417_v41 = vld [vmem:[%s4104_s8 + $0x110] sm:$0xff] }
 0x310   :  { %2966 = vmatprep.subr.bf16.mxu1 %v3117_v32  ;;  %v2943_v36 = vpack.c.bf16 %v2412_v35, %v2411_v34  ;;  %v2466_v34 = vld [vmem:[%s4104_s8 + $0x240] sm:$0xff]  ;;  %v2467_v35 = vld [vmem:[%s4104_s8 + $0x248] sm:$0xff] }
 0x313   :  { %2968 = vmatpush1.bf16.msra.mxu1 %v2967_v38  ;;  %v2414_v38 = vld [vmem:[%s4104_s8 + $0xf8] sm:$0xff] }
 0x314   :  { %2969 = vmatprep.subr.bf16.mxu1 %v3117_v32  ;;  %v2946_v10 = vpack.c.bf16 %v2414_v38, %v2413_v37  ;;  %v2441_v37 = vld [vmem:[%s4104_s8 + $0x1a0] sm:$0xff]  ;;  %v2442_v38 = vld [vmem:[%s4104_s8 + $0x1a8] sm:$0xff] }
 0x317   :  { %2971 = vmatpush1.bf16.msra.mxu1 %v2970_v40  ;;  %v2416_v40 = vld [vmem:[%s4104_s8 + $0x108] sm:$0xff] }
 0x318   :  { %2972 = vmatprep.subr.bf16.mxu1 %v3117_v32  ;;  %v2949_v6 = vpack.c.bf16 %v2416_v40, %v2415_v39  ;;  %v3015_v39 = vpack.c.bf16 %v2442_v38, %v2441_v37  ;;  %v2443_v40 = vld [vmem:[%s4104_s8 + $0x1b0] sm:$0xff] }
 0x31b   :  { %2974 = vmatpush1.bf16.msra.mxu1 %v2973_v42  ;;  %v2418_v42 = vld [vmem:[%s4104_s8 + $0x118] sm:$0xff] }
 0x31c   :  { %2975 = vmatprep.subr.bf16.mxu1 %v3117_v32  ;;  %v2952_v43 = vpack.c.bf16 %v2418_v42, %v2417_v41  ;;  %v2445_v42 = vld [vmem:[%s4104_s8 + $0x1c0] sm:$0xff] }
 0x31f   :  { %2977 = vmatpush1.bf16.msra.mxu1 %v2976_v45  ;;  %v2420_v45 = vld [vmem:[%s4104_s8 + $0x128] sm:$0xff] }
 0x320   :  { %2978 = vmatprep.subr.bf16.mxu1 %v3117_v32  ;;  %v2955_v46 = vpack.c.bf16 %v2420_v45, %v2419_v44  ;;  %v2447_v45 = vld [vmem:[%s4104_s8 + $0x1d0] sm:$0xff] }
 0x323   :  { %2980 = vmatpush1.bf16.msra.mxu1 %v2979_v48  ;;  %v2422_v48 = vld [vmem:[%s4104_s8 + $0x138] sm:$0xff] }
 0x324   :  { %2981 = vmatprep.subr.bf16.mxu1 %v3117_v32  ;;  %v2958_v49 = vpack.c.bf16 %v2422_v48, %v2421_v47  ;;  %v2468_v48 = vld [vmem:[%s4104_s8 + $0x250] sm:$0xff] }
 0x327   :  { %2983 = vmatpush1.bf16.msra.mxu1 %v2982_v51 }
 0x328   :  { %2984 = vmatprep.subr.bf16.mxu1 %v3117_v32 }
 0x32b   :  { %2986 = vmatpush1.bf16.msra.mxu1 %v2985_v54 }
 0x32c   :  { %2987 = vmatprep.subr.bf16.mxu1 %v3117_v32 }
 0x32f   :  { %2989 = vmatpush1.bf16.msra.mxu1 %v2988_v57  ;;  %v2429_v57 = vld [vmem:[%s4104_s8 + $0x140] sm:$0xff] }
 0x3dd   :  { %v1341_v0 = vpop.f32.mrb[12].mxu1 }
 0x3de   :  { %v1343_v4 = vpop.f32.mrb[13].mxu1  ;;  %v1368_v5 = vadd.f32 %v1361_v63, %v1341_v0  ;;  %v2431_v0 = vld [vmem:[%s4104_s8 + $0x150] sm:$0xff] }
 0x3df   :  { %v1369_v7 = vadd.f32 %v1365_v1, %v1343_v4  ;;  %v3036_v4 = vpack.c.bf16 %v2457_v61, %v2456_v60 }
 0x3e0   :  { %v1372_v12 = vmax.f32 %v1368_v5, 0.0  ;;  %v2458_v5 = vld [vmem:[%s4104_s8 + $0x200] sm:$0xff] }
 0x3e1   :  { %v1347_v8 = vpop.f32.mrb[14].mxu1  ;;  %v1373_v14 = vmax.f32 %v1369_v7, 0.0  ;;  %v2459_v7 = vld [vmem:[%s4104_s8 + $0x208] sm:$0xff] }
 0x3e2   :  { %v1370_v9 = vadd.f32 %v1361_v63, %v1347_v8  ;;  %v1349_v11 = vpop.f32.mrb[15].mxu1  ;;  %v2997_v63 = vpack.c.bf16 %v2430_v58, %v2429_v57 }
 0x3e3   :  { %v1371_v3 = vadd.f32 %v1365_v1, %v1349_v11  ;;  %v2432_v1 = vld [vmem:[%s4104_s8 + $0x158] sm:$0xff]  ;;  %v2434_v11 = vld [vmem:[%s4104_s8 + $0x168] sm:$0xff] }
 0x3e4   :  { %v1374_v13 = vmax.f32 %v1370_v9, 0.0  ;;  %v3000_v8 = vpack.c.bf16 %v2432_v1, %v2431_v0  ;;  %v2433_v9 = vld [vmem:[%s4104_s8 + $0x160] sm:$0xff] }
 0x3e5   :  { %v1375_v15 = vmax.f32 %v1371_v3, 0.0  ;;  %v3039_v3 = vpack.c.bf16 %v2459_v7, %v2458_v5  ;;  %v2479_v1 = vld [vmem:[%s4104_s8 + $0x280] sm:$0xff]  ;;  %v2475_v5 = vld [vmem:[%s4106_s7 + $0x8] sm:$0x3] }
 0x3e6   :  { %v3736_v17 = vpack.c.bf16 %v1374_v13, %v1372_v12  ;;  %v2460_v12 = vld [vmem:[%s4104_s8 + $0x210] sm:$0xff]  ;;  %v2461_v13 = vld [vmem:[%s4104_s8 + $0x218] sm:$0xff] }
 0x3e7   :  { %v3738_v18 = vpack.c.bf16 %v1375_v15, %v1373_v14  ;;  %v3003_v14 = vpack.c.bf16 %v2434_v11, %v2433_v9  ;;  %v2435_v15 = vld [vmem:[%s4104_s8 + $0x170] sm:$0xff]  ;;  %v3042_v20 = vpack.c.bf16 %v2461_v13, %v2460_v12  ;;  %v2482_v9 = vld [vmem:[%s4104_s8 + $0x298] sm:$0xff] }
 0x3e8   :  { %v2486_v12 = vld [vmem:[%s4104_s8 + $0x2b8] sm:$0xff] }
 0x3e9   :  { %2920 = vmatprep.subr.msk.bf16.mxu0 %vm3732_vm8, %v3738_v18  ;;  %3028 = vmatprep.subr.msk.bf16.mxu1 %vm3732_vm8, %v3738_v18 }
 0x3ea   :  { %2923 = vmatpush1.bf16.msk.msra.mxu0 %vm3732_vm8, %v3736_v17 }
 0x3eb   :  { %2926 = vmatprep.subr.msk.bf16.mxu0 %vm3732_vm8, %v3738_v18 }
 0x3ed   :  { %2398 = vmatmul.mubr.msk.f32.vlgmr.msra.gmra.mrb[4].mxu0 %vm1377_vm9, %v1376_v19  ;;  %v2436_v19 = vld [vmem:[%s4104_s8 + $0x178] sm:$0xff] }
 0x3ee   :  { %2929 = vmatpush1.bf16.msk.msra.mxu0 %vm3732_vm8, %v3736_v17  ;;  %1548 = vmatprep.mubr.f32.mxu0 %v3116_v2 }
 0x3ef   :  { %2930 = vmatprep.subr.bf16.mxu0 %v3117_v32 }
 0x3f1   :  { %2402 = vmatmul.mubr.msk.f32.vlgmr.msra.gmra.mrb[6].mxu0 %vm1377_vm9, %v2399_v22  ;;  %v2463_v22 = vld [vmem:[%s4104_s8 + $0x228] sm:$0xff] }
 0x3f2   :  { %2932 = vmatpush1.bf16.msra.mxu0 %v2931_v23  ;;  %v3006_v23 = vpack.c.bf16 %v2436_v19, %v2435_v15  ;;  %v2488_v15 = vld [vmem:[%s4104_s8 + $0x2c8] sm:$0xff] }
 0x3f3   :  { %2933 = vmatprep.subr.bf16.mxu0 %v3117_v32 }
 0x3f6   :  { %2935 = vmatpush1.bf16.msra.mxu0 %v2934_v26  ;;  %v3045_v26 = vpack.c.bf16 %v2463_v22, %v2462_v21  ;;  %v2490_v21 = vld [vmem:[%s4104_s8 + $0x2d8] sm:$0xff] }
 0x3f7   :  { %2936 = vmatprep.subr.bf16.mxu0 %v3117_v32 }
 0x3fa   :  { %2938 = vmatpush1.bf16.msra.mxu0 %v2937_v29  ;;  %v3009_v29 = vpack.c.bf16 %v2438_v25, %v2437_v24  ;;  %v2492_v24 = vld [vmem:[%s4104_s8 + $0x2e8] sm:$0xff] }
 0x3fb   :  { %2939 = vmatprep.subr.bf16.mxu0 %v3117_v32 }
 0x3fe   :  { %2941 = vmatpush1.bf16.msra.mxu0 %v2940_v33  ;;  %v3048_v33 = vpack.c.bf16 %v2465_v28, %v2464_v27  ;;  %v2494_v27 = vld [vmem:[%s4104_s8 + $0x2f8] sm:$0xff] }
 0x3ff   :  { %2942 = vmatprep.subr.bf16.mxu0 %v3117_v32 }
 0x402   :  { %2944 = vmatpush1.bf16.msra.mxu0 %v2943_v36  ;;  %v3012_v36 = vpack.c.bf16 %v2440_v31, %v2439_v30  ;;  %v2496_v30 = vld [vmem:[%s4104_s8 + $0x308] sm:$0xff] }
 0x403   :  { %2945 = vmatprep.subr.bf16.mxu0 %v3117_v32 }
 0x406   :  { %2947 = vmatpush1.bf16.msra.mxu0 %v2946_v10  ;;  %v3051_v10 = vpack.c.bf16 %v2467_v35, %v2466_v34  ;;  %v2498_v34 = vld [vmem:[%s4104_s8 + $0x318] sm:$0xff] }
 0x407   :  { %2948 = vmatprep.subr.bf16.mxu0 %v3117_v32 }
 0x40a   :  { %2950 = vmatpush1.bf16.msra.mxu0 %v2949_v6  ;;  %v2444_v6 = vld [vmem:[%s4104_s8 + $0x1b8] sm:$0xff] }
 0x40b   :  { %2951 = vmatprep.subr.bf16.mxu0 %v3117_v32  ;;  %v3018_v41 = vpack.c.bf16 %v2444_v6, %v2443_v40 }
 0x40e   :  { %2953 = vmatpush1.bf16.msra.mxu0 %v2952_v43  ;;  %v2446_v43 = vld [vmem:[%s4104_s8 + $0x1c8] sm:$0xff] }
 0x40f   :  { %2954 = vmatprep.subr.bf16.mxu0 %v3117_v32  ;;  %v3021_v44 = vpack.c.bf16 %v2446_v43, %v2445_v42  ;;  %v2500_v43 = vld [vmem:[%s4108_s9] ss:$0 sm:$0xff] }
 0x412   :  { %2956 = vmatpush1.bf16.msra.mxu0 %v2955_v46  ;;  %v2448_v46 = vld [vmem:[%s4104_s8 + $0x1d8] sm:$0xff] }
 0x413   :  { %2957 = vmatprep.subr.bf16.mxu0 %v3117_v32  ;;  %v3024_v47 = vpack.c.bf16 %v2448_v46, %v2447_v45 }
 0x416   :  { %2959 = vmatpush1.bf16.msra.mxu0 %v2958_v49  ;;  %v2469_v49 = vld [vmem:[%s4104_s8 + $0x258] sm:$0xff] }
 0x417   :  { %2992 = vmatprep.subr.msk.bf16.mxu0 %vm3732_vm8, %v3738_v18 }
 0x4c0   :  { %v1454_v50 = vpop.f32.mrb[4].mxu0 }
 0x4c1   :  { %v1456_v51 = vpop.f32.mrb[5].mxu0 }
 0x4c2   :  { %2424 = vmatprep.mubr.msk.f32.mxu1 %vm51_vm0, %v1456_v51  ;;  %v2470_v51 = vld [vmem:[%s4104_s8 + $0x260] sm:$0xff] }
 0x4c3   :  { %1717 = vmatmul.mubr.f32.vlgmr.msra.gmra.mrb[16].mxu1 %v1454_v50  ;;  %v3054_v50 = vpack.c.bf16 %v2469_v49, %v2468_v48 }
 0x4c4   :  { %3031 = vmatpush1.bf16.msk.msra.mxu1 %vm3732_vm8, %v3736_v17  ;;  %v1550_v54 = vpop.f32.mrb[6].mxu0  ;;  %1962 = vmatprep.mubr.f32.mxu1 %v3116_v2 }
 0x4c5   :  { %v1552_v56 = vpop.f32.mrb[7].mxu0  ;;  %3032 = vmatprep.subr.bf16.mxu1 %v3117_v32 }
 0x4c6   :  { %2423 = vmatprep.mubr.msk.f32.mxu0 %vm51_vm0, %v1552_v56 }
 0x4c7   :  { %1644 = vmatmul.mubr.f32.vlgmr.msra.gmra.mrb[8].mxu0 %v1550_v54  ;;  %2453 = vmatmul.mubr.msk.f32.vlgmr.msra.gmra.mrb[18].mxu1 %vm1377_vm9, %v2450_v55  ;;  %v2473_v54 = vld [vmem:[%s4104_s8 + $0x278] sm:$0xff] }
 0x4c8   :  { %2995 = vmatpush1.bf16.msk.msra.mxu0 %vm3732_vm8, %v3736_v17  ;;  %1791 = vmatprep.mubr.f32.mxu0 %v3116_v2  ;;  %v3060_v55 = vpack.c.bf16 %v2473_v54, %v2472_v53 }
 0x4c9   :  { %2996 = vmatprep.subr.bf16.mxu0 %v3117_v32  ;;  %3034 = vmatpush1.bf16.msra.mxu1 %v3033_v59 }
 0x4ca   :  { %3035 = vmatprep.subr.bf16.mxu1 %v3117_v32 }
 0x4cb   :  { %2428 = vmatmul.mubr.msk.f32.vlgmr.msra.gmra.mrb[10].mxu0 %vm1377_vm9, %v2425_v62 }
 0x4cc   :  { %2998 = vmatpush1.bf16.msra.mxu0 %v2997_v63 }
 0x4cd   :  { %2999 = vmatprep.subr.bf16.mxu0 %v3117_v32  ;;  %3037 = vmatpush1.bf16.msra.mxu1 %v3036_v4  ;;  %v2480_v4 = vld [vmem:[%s4104_s8 + $0x288] sm:$0xff] }
 0x4ce   :  { %3038 = vmatprep.subr.bf16.mxu1 %v3117_v32  ;;  %v3069_v7 = vpack.c.bf16 %v2480_v4, %v2479_v1 }
 0x4d0   :  { %3001 = vmatpush1.bf16.msra.mxu0 %v3000_v8  ;;  %v2481_v8 = vld [vmem:[%s4104_s8 + $0x290] sm:$0xff] }
 0x4d1   :  { %3002 = vmatprep.subr.bf16.mxu0 %v3117_v32  ;;  %3040 = vmatpush1.bf16.msra.mxu1 %v3039_v3  ;;  %v3072_v16 = vpack.c.bf16 %v2482_v9, %v2481_v8  ;;  %v2485_v3 = vld [vmem:[%s4104_s8 + $0x2b0] sm:$0xff] }
 0x4d2   :  { %3041 = vmatprep.subr.bf16.mxu1 %v3117_v32  ;;  %v3078_v13 = vpack.c.bf16 %v2486_v12, %v2485_v3 }
 0x4d4   :  { %3004 = vmatpush1.bf16.msra.mxu0 %v3003_v14  ;;  %v2487_v14 = vld [vmem:[%s4104_s8 + $0x2c0] sm:$0xff] }
 0x4d5   :  { %3005 = vmatprep.subr.bf16.mxu0 %v3117_v32  ;;  %3043 = vmatpush1.bf16.msra.mxu1 %v3042_v20  ;;  %v3081_v19 = vpack.c.bf16 %v2488_v15, %v2487_v14  ;;  %v2489_v20 = vld [vmem:[%s4104_s8 + $0x2d0] sm:$0xff] }
 0x4d6   :  { %3044 = vmatprep.subr.bf16.mxu1 %v3117_v32  ;;  %v3084_v22 = vpack.c.bf16 %v2490_v21, %v2489_v20 }
 0x4d8   :  { %3007 = vmatpush1.bf16.msra.mxu0 %v3006_v23  ;;  %v2491_v23 = vld [vmem:[%s4104_s8 + $0x2e0] sm:$0xff] }
 0x4d9   :  { %3008 = vmatprep.subr.bf16.mxu0 %v3117_v32  ;;  %3046 = vmatpush1.bf16.msra.mxu1 %v3045_v26  ;;  %v3087_v25 = vpack.c.bf16 %v2492_v24, %v2491_v23  ;;  %v2493_v26 = vld [vmem:[%s4104_s8 + $0x2f0] sm:$0xff] }
 0x4da   :  { %3047 = vmatprep.subr.bf16.mxu1 %v3117_v32  ;;  %v3090_v28 = vpack.c.bf16 %v2494_v27, %v2493_v26 }
 0x4dc   :  { %3010 = vmatpush1.bf16.msra.mxu0 %v3009_v29  ;;  %v2495_v29 = vld [vmem:[%s4104_s8 + $0x300] sm:$0xff] }
 0x4dd   :  { %3011 = vmatprep.subr.bf16.mxu0 %v3117_v32  ;;  %3049 = vmatpush1.bf16.msra.mxu1 %v3048_v33  ;;  %v3093_v31 = vpack.c.bf16 %v2496_v30, %v2495_v29  ;;  %v2497_v33 = vld [vmem:[%s4104_s8 + $0x310] sm:$0xff] }
 0x4de   :  { %3050 = vmatprep.subr.bf16.mxu1 %v3117_v32  ;;  %v3096_v35 = vpack.c.bf16 %v2498_v34, %v2497_v33 }
 0x4e0   :  { %3013 = vmatpush1.bf16.msra.mxu0 %v3012_v36 }
 0x4e1   :  { %3014 = vmatprep.subr.bf16.mxu0 %v3117_v32  ;;  %3052 = vmatpush1.bf16.msra.mxu1 %v3051_v10 }
 0x4e2   :  { %3053 = vmatprep.subr.bf16.mxu1 %v3117_v32 }
 0x4e4   :  { %3016 = vmatpush1.bf16.msra.mxu0 %v3015_v39 }
 0x4e5   :  { %3017 = vmatprep.subr.bf16.mxu0 %v3117_v32  ;;  %3055 = vmatpush1.bf16.msra.mxu1 %v3054_v50 }
 0x4e6   :  { %3056 = vmatprep.subr.bf16.mxu1 %v3117_v32 }
 0x4e8   :  { %3019 = vmatpush1.bf16.msra.mxu0 %v3018_v41 }
 0x4e9   :  { %3020 = vmatprep.subr.bf16.mxu0 %v3117_v32 }
 0x4ec   :  { %3022 = vmatpush1.bf16.msra.mxu0 %v3021_v44 }
 0x4ed   :  { %3023 = vmatprep.subr.bf16.mxu0 %v3117_v32 }
 0x4f0   :  { %3025 = vmatpush1.bf16.msra.mxu0 %v3024_v47  ;;  %v2501_v47 = vld [vmem:[%s4109_s10] ss:$0 sm:$0xff] }
 0x4f1   :  { %3064 = vmatprep.subr.msk.bf16.mxu0 %vm3732_vm8, %v3738_v18  ;;  %v2471_v18 = vld [vmem:[%s4104_s8 + $0x268] sm:$0xff] }
 0x4f2   :  { %v3057_v52 = vpack.c.bf16 %v2471_v18, %v2470_v51 }
 0x4f4   :  { %3058 = vmatpush1.bf16.msra.mxu1 %v3057_v52 }
 0x4f5   :  { %3059 = vmatprep.subr.bf16.mxu1 %v3117_v32 }
 0x4f8   :  { %3061 = vmatpush1.bf16.msra.mxu1 %v3060_v55 }
 0x596   :  { %v1718_v56 = vpop.f32.mrb[16].mxu1 }
 0x597   :  { %v1720_v57 = vpop.f32.mrb[17].mxu1 }
 0x59a   :  { %v1645_v58 = vpop.f32.mrb[8].mxu0  ;;  %v1964_v59 = vpop.f32.mrb[18].mxu1 }
 0x59b   :  { %v3998_v60 = vadd.f32 %v1718_v56, %v1645_v58  ;;  %v1647_v61 = vpop.f32.mrb[9].mxu0  ;;  %v1966_v62 = vpop.f32.mrb[19].mxu1 }
 0x59c   :  { %2474 = vmatprep.mubr.msk.f32.mxu1 %vm51_vm0, %v1966_v62 }
 0x59d   :  { %2058 = vmatmul.mubr.f32.vlgmr.msra.gmra.mrb[20].mxu1 %v1964_v59 }
 0x59e   :  { %v1793_v63 = vpop.f32.mrb[10].mxu0 }
 0x59f   :  { %v1795_v0 = vpop.f32.mrb[11].mxu0 }
 0x5a0   :  { %2449 = vmatprep.mubr.msk.f32.mxu0 %vm51_vm0, %v1795_v0 }
 0x5a1   :  { %1887 = vmatmul.mubr.f32.vlgmr.msra.gmra.mrb[12].mxu0 %v1793_v63 }
 0x5a2   :  { %3067 = vmatpush1.bf16.msk.msra.mxu0 %vm3732_vm8, %v3736_v17  ;;  %2133 = vmatprep.mubr.f32.mxu0 %v3116_v2  ;;  %v2483_v2 = vld [vmem:[%s4104_s8 + $0x2a0] sm:$0xff]  ;;  %v2484_v17 = vld [vmem:[%s4104_s8 + $0x2a8] sm:$0xff] }
 0x5a3   :  { %3068 = vmatprep.subr.bf16.mxu0 %v3117_v32  ;;  %v3075_v11 = vpack.c.bf16 %v2484_v17, %v2483_v2 }
 0x5a5   :  { %2478 = vmatmul.mubr.msk.f32.vlgmr.msra.gmra.mrb[14].mxu0 %vm1377_vm9, %v2475_v5 }
 0x5a6   :  { %3070 = vmatpush1.bf16.msra.mxu0 %v3069_v7 }
 0x5a7   :  { %3071 = vmatprep.subr.bf16.mxu0 %v3117_v32 }
 0x5aa   :  { %3073 = vmatpush1.bf16.msra.mxu0 %v3072_v16 }
 0x5ab   :  { %3074 = vmatprep.subr.bf16.mxu0 %v3117_v32 }
 0x5ae   :  { %3076 = vmatpush1.bf16.msra.mxu0 %v3075_v11 }
 0x5af   :  { %3077 = vmatprep.subr.bf16.mxu0 %v3117_v32 }
 0x5b2   :  { %3079 = vmatpush1.bf16.msra.mxu0 %v3078_v13 }
 0x5b3   :  { %3080 = vmatprep.subr.bf16.mxu0 %v3117_v32 }
 0x5b6   :  { %3082 = vmatpush1.bf16.msra.mxu0 %v3081_v19 }
 0x5b7   :  { %3083 = vmatprep.subr.bf16.mxu0 %v3117_v32 }
 0x5ba   :  { %3085 = vmatpush1.bf16.msra.mxu0 %v3084_v22 }
 0x5bb   :  { %3086 = vmatprep.subr.bf16.mxu0 %v3117_v32 }
 0x5be   :  { %3088 = vmatpush1.bf16.msra.mxu0 %v3087_v25 }
 0x5bf   :  { %3089 = vmatprep.subr.bf16.mxu0 %v3117_v32 }
 0x5c2   :  { %3091 = vmatpush1.bf16.msra.mxu0 %v3090_v28 }
 0x5c3   :  { %3092 = vmatprep.subr.bf16.mxu0 %v3117_v32 }
 0x5c6   :  { %3094 = vmatpush1.bf16.msra.mxu0 %v3093_v31 }
 0x5c7   :  { %3095 = vmatprep.subr.bf16.mxu0 %v3117_v32  ;;  %v19_v32 = vstv %s4107_s11 }
 0x5c8   :  { %20 = vst [vmem:[#allocation2] sm:$0x1] %v19_v32 }
 0x5ca   :  { %3097 = vmatpush1.bf16.msra.mxu0 %v3096_v35 }
 0x5cf   :  { %v2502_v51 = vld [vmem:[#allocation2] ss:$0 sm:$0xff] }
 0x670   :  { %v2059_v36 = vpop.f32.mrb[20].mxu1 }
 0x671   :  { %v2061_v37 = vpop.f32.mrb[21].mxu1 }
 0x674   :  { %v1888_v38 = vpop.f32.mrb[12].mxu0 }
 0x675   :  { %v1892_v10 = vadd.f32 %v1888_v38, %v3998_v60  ;;  %v1890_v39 = vpop.f32.mrb[13].mxu0 }
 0x677   :  { %v2063_v40 = vadd.f32 %v2059_v36, %v1892_v10 }
 0x678   :  { %v2135_v6 = vpop.f32.mrb[14].mxu0 }
 0x679   :  { %v2137_v41 = vpop.f32.mrb[15].mxu0 }
 0x67a   :  { %2499 = vmatprep.mubr.msk.f32.mxu0 %vm51_vm0, %v2137_v41 }
 0x67b   :  { %2229 = vmatmul.mubr.f32.vlgmr.msra.gmra.mrb[16].mxu0 %v2135_v6 }
 0x74e   :  { %v2230_v42 = vpop.f32.mrb[16].mxu0 }
 0x74f   :  { %v2234_v44 = vadd.f32 %v2230_v42, %v2063_v40  ;;  %v2232_v45 = vpop.f32.mrb[17].mxu0 }
 0x751   :  { %v2242_v46 = vadd.f32 %v2500_v43, %v2234_v44 }
 0x753   :  { %v2243_v48 = vmax.f32 %v2242_v46, 0.0 }
 0x755   :  { %2244 = vst [vmem:[%s4110_s12] sm:$0x3] %v2243_v48  ;;  %v2252_v49 = vmul.f32 %v2501_v47, %v2243_v48 }
 0x757   :  { %v2253_v50 = vsel %vm1381_vm7, %v2252_v49, 0.0 }
 0x758   :  { %2254 = vadd.xlane.f32.xlu0 %v2253_v50 }
 0x7e5   :  { %v2255_v18 = vpop.xlane.xlu0 %2254 }
 0x7e6   :  { %v2263_v52 = vadd.f32 %v2502_v51, %v2255_v18 }
 0x7e8   :  { %2265 = vst.msk [vmem:[%s4111_s13] sm:$0x3] %vm2264_vm10, %v2263_v52 }

</bundles_post_ra>
